<compile_context>
chip_gen: v7x
topology: tpu7x:2x2x1
jax: 0.10.0
libtpu: 0.0.40
codegen_flags: <defaults>
</compile_context>

<pallas_src>
import functools

import jax
import jax.numpy as jnp
from jax import lax
from jax.experimental import pallas as pl
from jax.experimental.pallas import tpu as pltpu

_NEG_BIG = -9.0e15
_INV_SQRT2 = 0.7071067811865476
_VMEM_LIMIT = 32 * 1024 * 1024  # explicit; safe on v5e/v6e (128 MiB) and v7x (64 MiB)


def _erf(x):
    # Abramowitz & Stegun 7.1.26 (|err| < 1.5e-7): exact (erf-based) GELU --
    # PyTorch's F.gelu default -- using only exp/mul/add/select on VPU/EUP.
    a1, a2, a3, a4, a5 = (0.254829592, -0.284496736, 1.421413741,
                          -1.453152027, 1.061405429)
    p = 0.3275911
    s = jnp.where(x >= 0.0, 1.0, -1.0)
    ax = jnp.abs(x)
    t = 1.0 / (1.0 + p * ax)
    poly = ((((a5 * t + a4) * t + a3) * t + a2) * t + a1) * t
    return s * (1.0 - poly * jnp.exp(-ax * ax))


def _gelu_exact(x):
    # TODO(synk): tanh-GELU would push more work onto the EUP but changes the
    # numerics vs. PyTorch's erf-based default; keeping the erf form.
    return 0.5 * x * (1.0 + _erf(x * _INV_SQRT2))


def _layer_norm(x, gamma, beta, eps=1e-5):
    mean = jnp.mean(x, axis=-1, keepdims=True)
    var = jnp.mean((x - mean) ** 2, axis=-1, keepdims=True)
    return (x - mean) * lax.rsqrt(var + eps) * gamma + beta


def _relation_bias(rel_masks, a3_ref, row, num_relation):
    # rel_bias[i, j] = a3[row, adj[i, j]]  (hard one-hot relation embedding),
    # built from compare masks shared across heads + SMEM scalar broadcasts.
    rel = jnp.zeros(rel_masks[0].shape, jnp.float32)
    for r in range(num_relation):
        rel = rel + jnp.where(rel_masks[r], a3_ref[row, r], 0.0)
    return rel


def _attention(wh, f1, f2, adj_pos, rel_bias, alpha):
    """LeakyReLU scores -> masked softmax -> attention @ Wh."""
    e = f1 + f2 + rel_bias
    e = jnp.where(e > 0.0, e, alpha * e)                 # LeakyReLU(alpha)
    masked = jnp.where(adj_pos, e, _NEG_BIG)
    m = jnp.max(masked, axis=-1, keepdims=True)
    p = jnp.exp(masked - m)
    # EUP approximate reciprocal instead of an O(N^2)-feeding VPU divide.
    inv = pl.reciprocal(jnp.sum(p, axis=-1, keepdims=True), approx=True)
    att = p * inv
    # TODO(synk): attention dropout omitted (eval-mode forward).
    return jnp.dot(att, wh, preferred_element_type=jnp.float32)


# ----------------------------------------------------------------------------
# Fully fused RGAT kernel: one batch element per grid step.
#   first-layer heads (packed) -> concat in VMEM -> out_att -> GELU -> fc
#   -> +residual -> LayerNorm
# ----------------------------------------------------------------------------
def _rgat_fused_kernel(x_ref, adj_ref,
                       w_cat_ref, a1_cat_ref, a2_cat_ref, a3_ref,
                       gamma_cat_ref, beta_cat_ref,
                       w_out_ref, a1_out_ref, a2_out_ref,
                       gamma_out_ref, beta_out_ref,
                       fc_w_ref, fc_b_ref, ln_g_ref, ln_b_ref,
                       out_ref, *,
                       alpha, num_heads, num_relation, fout):
    x = x_ref[...]            # (N, Fin)  -- also the residual
    adj = adj_ref[...]        # (N, N) int32 relation ids

    # Relation compare masks / edge mask shared by all heads AND out_att.
    rel_masks = [adj == r for r in range(num_relation)]
    adj_pos = adj > 0

    # ---- first GAT layer, all heads --------------------------------------
    # One MXU pass for every head's projection: (N, Fin) @ (Fin, H*Fout).
    wh_all = jnp.dot(x, w_cat_ref[...], preferred_element_type=jnp.float32)

    # One MXU pass each for all heads' f1 (columns) / f2 (rows) via
    # block-diagonal packed `a` vectors -- no per-head 1-wide matmuls.
    f1_all = jnp.dot(wh_all, a1_cat_ref[...],
                     preferred_element_type=jnp.float32)            # (N, H)
    f2_all = lax.dot_general(a2_cat_ref[...], wh_all,
                             (((1,), (1,)), ((), ())),
                             preferred_element_type=jnp.float32)    # (H, N)

    outs = []
    for h in range(num_heads):
        wh = wh_all[:, h * fout:(h + 1) * fout]
        rel = _relation_bias(rel_masks, a3_ref, h, num_relation)
        hp = _attention(wh, f1_all[:, h:h + 1], f2_all[h:h + 1, :],
                        adj_pos, rel, alpha)
        hp = _layer_norm(hp, gamma_cat_ref[h:h + 1, :], beta_cat_ref[h:h + 1, :])
        outs.append(_gelu_exact(hp))

    # Heads concatenated in VMEM only -- never round-trips through HBM.
    xc = jnp.concatenate(outs, axis=-1)                             # (N, H*Fout)

    # ---- out_att layer (concat=False) -------------------------------------
    wh2 = jnp.dot(xc, w_out_ref[...], preferred_element_type=jnp.float32)  # (N, Fout)
    f1 = jnp.dot(wh2, a1_out_ref[...], preferred_element_type=jnp.float32)  # (N, 1)
    f2 = lax.dot_general(a2_out_ref[...], wh2, (((1,), (1,)), ((), ())),
                         preferred_element_type=jnp.float32)                # (1, N)
    rel = _relation_bias(rel_masks, a3_ref, num_heads, num_relation)
    hp = _attention(wh2, f1, f2, adj_pos, rel, alpha)
    hp = _layer_norm(hp, gamma_out_ref[...], beta_out_ref[...])

    # ---- RGAT head: GELU -> fc -> +residual -> LayerNorm ------------------
    y = jnp.dot(_gelu_exact(hp), fc_w_ref[...],
                preferred_element_type=jnp.float32) + fc_b_ref[...]
    y = y + x
    out_ref[...] = _layer_norm(y, ln_g_ref[...], ln_b_ref[...])


# ----------------------------------------------------------------------------
# pallas_call wrapper.
# ----------------------------------------------------------------------------
def _per_batch(*tail):
    """BlockSpec for (B, *tail) arrays: squeeze the batch dim, block = rest."""
    nz = (0,) * len(tail)
    return pl.BlockSpec((pl.Squeezed(),) + tuple(tail), lambda b: (b,) + nz)


def _vmem():
    # Whole array resident in VMEM for the entire grid (no per-step DMA /
    # double-buffering of constants).
    return pl.BlockSpec(memory_space=pltpu.MemorySpace.VMEM)


def _smem():
    # Small scalar table (relation bias values) read as SMEM scalars.
    return pl.BlockSpec(memory_space=pltpu.MemorySpace.SMEM)


def rgat_forward(x, adj, params, *, alpha=0.2):
    """Full RGAT forward.  Param packing happens in plain JAX; the rest is one
    fused Pallas kernel per batch element."""
    heads = params["attentions"]
    H = len(heads)
    fout = heads[0]["W"].shape[1]
    R = heads[0]["a3"].shape[1]
    B, N, fin = x.shape

    # Pack per-head params so one kernel computes all heads + the concat.
    w_cat = jnp.concatenate([p["W"] for p in heads], axis=1)       # (Fin, H*Fout)
    a1_cat = jnp.zeros((H * fout, H), jnp.float32)                 # block-diag a1
    a2_cat = jnp.zeros((H, H * fout), jnp.float32)                 # block-diag a2
    for h, p in enumerate(heads):
        a1_cat = a1_cat.at[h * fout:(h + 1) * fout, h:h + 1].set(p["a1"])
        a2_cat = a2_cat.at[h:h + 1, h * fout:(h + 1) * fout].set(p["a2"])
    gamma_cat = jnp.concatenate([p["gamma"] for p in heads], axis=0)   # (H, Fout)
    beta_cat = jnp.concatenate([p["beta"] for p in heads], axis=0)     # (H, Fout)

    p_out = params["out_att"]
    # One SMEM scalar table for all relation-bias rows: heads 0..H-1, out_att at row H.
    a3_all = jnp.concatenate([p["a3"] for p in heads] + [p_out["a3"]], axis=0)  # (H+1, R)

    kernel = functools.partial(_rgat_fused_kernel, alpha=alpha,
                               num_heads=H, num_relation=R, fout=fout)

    # TODO(synk): F.dropout calls omitted (eval-mode / training=False forward).
    return pl.pallas_call(
        kernel,
        out_shape=jax.ShapeDtypeStruct((B, N, fout), jnp.float32),
        grid=(B,),
        in_specs=[
            _per_batch(N, fin),     # x (also residual)
            _per_batch(N, N),       # adj
            _vmem(),                # W_cat       (Fin, H*Fout)
            _vmem(),                # a1_cat      (H*Fout, H)  block-diagonal
            _vmem(),                # a2_cat      (H, H*Fout)  block-diagonal
            _smem(),                # a3_all      (H+1, R) scalar table
            _vmem(),                # gamma_cat   (H, Fout)
            _vmem(),                # beta_cat    (H, Fout)
            _vmem(),                # W_out       (H*Fout, Fout)
            _vmem(),                # a1_out      (Fout, 1)
            _vmem(),                # a2_out      (1, Fout)
            _vmem(),                # out_att layer-norm gamma
            _vmem(),                # out_att layer-norm beta
            _vmem(),                # fc_w        (Fout, Fout)
            _vmem(),                # fc_b        (1, Fout)
            _vmem(),                # final layer-norm gamma
            _vmem(),                # final layer-norm beta
        ],
        out_specs=_per_batch(N, fout),
        compiler_params=pltpu.CompilerParams(
            dimension_semantics=("parallel",),
            vmem_limit_bytes=_VMEM_LIMIT),
    )(x, adj, w_cat, a1_cat, a2_cat, a3_all, gamma_cat, beta_cat,
      p_out["W"], p_out["a1"], p_out["a2"], p_out["gamma"], p_out["beta"],
      params["fc_w"], params["fc_b"], params["ln_gamma"], params["ln_beta"])


# ----------------------------------------------------------------------------
# Deterministic parameter init (xavier_uniform, gain=1.414, like the module).
# ----------------------------------------------------------------------------
def _xavier_uniform(key, shape, gain=1.414):
    fan_in, fan_out = shape
    limit = gain * (6.0 / (fan_in + fan_out)) ** 0.5
    return jax.random.uniform(key, shape, jnp.float32, -limit, limit)


def init_gat_params(key, fin, fout, num_relation):
    k_w, k_a = jax.random.split(key)
    W = _xavier_uniform(k_w, (fin, fout))
    a = _xavier_uniform(k_a, (2 * fout + num_relation, 1))
    return {
        "W": W,
        "a1": a[:fout],                                   # (Fout, 1)
        "a2": a[fout:2 * fout].reshape(1, fout),          # (1, Fout)
        "a3": a[2 * fout:].reshape(1, num_relation),      # (1, R)
        "gamma": jnp.ones((1, fout), jnp.float32),
        "beta": jnp.zeros((1, fout), jnp.float32),
    }


# ----------------------------------------------------------------------------
# Pure-JAX reference (same math, no Pallas) used as a correctness check.
# ----------------------------------------------------------------------------
def _gat_layer_ref(h, adj, p, alpha=0.2, concat=True):
    wh = h @ p["W"]                                           # (B, N, Fout)
    f1 = wh @ p["a1"]                                         # (B, N, 1)
    f2 = jnp.einsum("bnf,f->bn", wh, p["a2"][0])[:, None, :]  # (B, 1, N)
    rel = p["a3"][0][adj]                                     # (B, N, N)
    e = f1 + f2 + rel
    e = jnp.where(e > 0, e, alpha * e)
    masked = jnp.where(adj > 0, e, _NEG_BIG)
    att = jax.nn.softmax(masked, axis=-1)
    hp = att @ wh
    hp = _layer_norm(hp, p["gamma"], p["beta"])
    return _gelu_exact(hp) if concat else hp


def rgat_ref(x, adj, params, alpha=0.2):
    res = x
    heads = [_gat_layer_ref(x, adj, p, alpha, True) for p in params["attentions"]]
    xc = jnp.concatenate(heads, axis=-1)
    out = _gat_layer_ref(xc, adj, params["out_att"], alpha, False)
    y = _gelu_exact(out) @ params["fc_w"] + params["fc_b"]
    y = y + res
    return _layer_norm(y, params["ln_gamma"], params["ln_beta"])


if __name__ == "__main__":
    B, N = 2, 8
    nfeat = nhid = 32            # residual (x + fc-output) requires nfeat == nhid
    nheads, num_relation = 2, 5

    key = jax.random.PRNGKey(0)
    keys = jax.random.split(key, 4 + nheads)
    k_x, k_adj, k_fc, k_out = keys[0], keys[1], keys[2], keys[3]
    k_heads = keys[4:]

    x = jax.random.normal(k_x, (B, N, nfeat), jnp.float32)
    adj = jax.random.randint(k_adj, (B, N, N), 0, num_relation, jnp.int32)

    bound = 1.0 / (nhid ** 0.5)
    params = {
        "attentions": [init_gat_params(k_heads[i], nfeat, nhid, num_relation)
                       for i in range(nheads)],
        "out_att": init_gat_params(k_out, nhid * nheads, nhid, num_relation),
        "fc_w": jax.random.uniform(k_fc, (nhid, nhid), jnp.float32,
                                   -bound, bound),
        "fc_b": jnp.zeros((1, nhid), jnp.float32),
        "ln_gamma": jnp.ones((1, nhid), jnp.float32),
        "ln_beta": jnp.zeros((1, nhid), jnp.float32),
    }

    y = rgat_forward(x, adj, params)
    y = jax.block_until_ready(y)

    y_ref = rgat_ref(x, adj, params)
    assert y.shape == (B, N, nhid)
    assert bool(jnp.all(jnp.isfinite(y)))
    # 1e-3 tolerance covers the EUP approximate reciprocal in the softmax
    # (its per-row scale error is cancelled by the following LayerNorm).
    max_err = float(jnp.max(jnp.abs(y - y_ref)))
    assert bool(jnp.allclose(y, y_ref, rtol=1e-3, atol=1e-3)), max_err
    print("KERNEL_OK")
</pallas_src>

<mosaic_0001>
module attributes {stable_mosaic.version = 11 : i64} {
  func.func @_rgat_fused_kernel(%arg0: i32, %arg1: memref<1x8x32xf32, #tpu.memory_space<vmem>>, %arg2: memref<1x8x8xi32, #tpu.memory_space<vmem>>, %arg3: memref<32x64xf32, #tpu.memory_space<vmem>>, %arg4: memref<64x2xf32, #tpu.memory_space<vmem>>, %arg5: memref<2x64xf32, #tpu.memory_space<vmem>>, %arg6: memref<3x5xf32, #tpu.memory_space<smem>>, %arg7: memref<2x32xf32, #tpu.memory_space<vmem>>, %arg8: memref<2x32xf32, #tpu.memory_space<vmem>>, %arg9: memref<64x32xf32, #tpu.memory_space<vmem>>, %arg10: memref<32x1xf32, #tpu.memory_space<vmem>>, %arg11: memref<1x32xf32, #tpu.memory_space<vmem>>, %arg12: memref<1x32xf32, #tpu.memory_space<vmem>>, %arg13: memref<1x32xf32, #tpu.memory_space<vmem>>, %arg14: memref<32x32xf32, #tpu.memory_space<vmem>>, %arg15: memref<1x32xf32, #tpu.memory_space<vmem>>, %arg16: memref<1x32xf32, #tpu.memory_space<vmem>>, %arg17: memref<1x32xf32, #tpu.memory_space<vmem>>, %arg18: memref<1x8x32xf32, #tpu.memory_space<vmem>>) attributes {dimension_semantics = [#tpu.dimension_semantics<parallel>], iteration_bounds = array<i64: 2>, scalar_prefetch = 0 : i64, scratch_operands = 0 : i64, tpu.core_type = #tpu.core_type<tc>, window_params = [{transform_indices = @transform_0, window_bounds = array<i64: 1, 8, 32>}, {transform_indices = @transform_1, window_bounds = array<i64: 1, 8, 8>}, {pipeline_mode = #tpu.pipeline_mode<synchronous>, transform_indices = @transform_2, window_bounds = array<i64: 32, 64>}, {pipeline_mode = #tpu.pipeline_mode<synchronous>, transform_indices = @transform_3, window_bounds = array<i64: 64, 2>}, {pipeline_mode = #tpu.pipeline_mode<synchronous>, transform_indices = @transform_4, window_bounds = array<i64: 2, 64>}, {transform_indices = @transform_5, window_bounds = array<i64: 3, 5>}, {pipeline_mode = #tpu.pipeline_mode<synchronous>, transform_indices = @transform_6, window_bounds = array<i64: 2, 32>}, {pipeline_mode = #tpu.pipeline_mode<synchronous>, transform_indices = @transform_7, window_bounds = array<i64: 2, 32>}, {pipeline_mode = #tpu.pipeline_mode<synchronous>, transform_indices = @transform_8, window_bounds = array<i64: 64, 32>}, {pipeline_mode = #tpu.pipeline_mode<synchronous>, transform_indices = @transform_9, window_bounds = array<i64: 32, 1>}, {pipeline_mode = #tpu.pipeline_mode<synchronous>, transform_indices = @transform_10, window_bounds = array<i64: 1, 32>}, {pipeline_mode = #tpu.pipeline_mode<synchronous>, transform_indices = @transform_11, window_bounds = array<i64: 1, 32>}, {pipeline_mode = #tpu.pipeline_mode<synchronous>, transform_indices = @transform_12, window_bounds = array<i64: 1, 32>}, {pipeline_mode = #tpu.pipeline_mode<synchronous>, transform_indices = @transform_13, window_bounds = array<i64: 32, 32>}, {pipeline_mode = #tpu.pipeline_mode<synchronous>, transform_indices = @transform_14, window_bounds = array<i64: 1, 32>}, {pipeline_mode = #tpu.pipeline_mode<synchronous>, transform_indices = @transform_15, window_bounds = array<i64: 1, 32>}, {pipeline_mode = #tpu.pipeline_mode<synchronous>, transform_indices = @transform_16, window_bounds = array<i64: 1, 32>}, {transform_indices = @transform_17, window_bounds = array<i64: 1, 8, 32>}]} {
    %c0 = arith.constant 0 : index
    %c0_0 = arith.constant 0 : index
    %c0_1 = arith.constant 0 : index
    %0 = vector.load %arg1[%c0, %c0_0, %c0_1] : memref<1x8x32xf32, #tpu.memory_space<vmem>>, vector<1x8x32xf32>
    %1 = vector.shape_cast %0 : vector<1x8x32xf32> to vector<8x32xf32>
    %c0_2 = arith.constant 0 : index
    %c0_3 = arith.constant 0 : index
    %c0_4 = arith.constant 0 : index
    %2 = vector.load %arg2[%c0_2, %c0_3, %c0_4] : memref<1x8x8xi32, #tpu.memory_space<vmem>>, vector<1x8x8xi32>
    %3 = vector.shape_cast %2 : vector<1x8x8xi32> to vector<8x8xi32>
    %c0_i32 = arith.constant 0 : i32
    %4 = vector.broadcast %c0_i32 : i32 to vector<8x8xi32>
    %5 = arith.cmpi eq, %3, %4 : vector<8x8xi32>
    %c1_i32 = arith.constant 1 : i32
    %6 = vector.broadcast %c1_i32 : i32 to vector<8x8xi32>
    %7 = arith.cmpi eq, %3, %6 : vector<8x8xi32>
    %c2_i32 = arith.constant 2 : i32
    %8 = vector.broadcast %c2_i32 : i32 to vector<8x8xi32>
    %9 = arith.cmpi eq, %3, %8 : vector<8x8xi32>
    %c3_i32 = arith.constant 3 : i32
    %10 = vector.broadcast %c3_i32 : i32 to vector<8x8xi32>
    %11 = arith.cmpi eq, %3, %10 : vector<8x8xi32>
    %c4_i32 = arith.constant 4 : i32
    %12 = vector.broadcast %c4_i32 : i32 to vector<8x8xi32>
    %13 = arith.cmpi eq, %3, %12 : vector<8x8xi32>
    %c0_i32_5 = arith.constant 0 : i32
    %14 = vector.broadcast %c0_i32_5 : i32 to vector<8x8xi32>
    %15 = arith.cmpi sgt, %3, %14 : vector<8x8xi32>
    %c0_6 = arith.constant 0 : index
    %c0_7 = arith.constant 0 : index
    %16 = vector.load %arg3[%c0_6, %c0_7] : memref<32x64xf32, #tpu.memory_space<vmem>>, vector<32x64xf32>
    %cst = arith.constant dense<0.000000e+00> : vector<8x64xf32>
    %17 = tpu.matmul %1, %16, %cst {dimension_numbers = #tpu.dot_dimension_numbers<[1], [0], [0], [1], [0, 0, 1, 1], [], []>} : vector<8x32xf32>, vector<32x64xf32>, vector<8x64xf32> -> vector<8x64xf32>
    %c0_8 = arith.constant 0 : index
    %c0_9 = arith.constant 0 : index
    %18 = vector.load %arg4[%c0_8, %c0_9] : memref<64x2xf32, #tpu.memory_space<vmem>>, vector<64x2xf32>
    %cst_10 = arith.constant dense<0.000000e+00> : vector<8x2xf32>
    %19 = tpu.matmul %17, %18, %cst_10 {dimension_numbers = #tpu.dot_dimension_numbers<[1], [0], [0], [1], [0, 0, 1, 1], [], []>} : vector<8x64xf32>, vector<64x2xf32>, vector<8x2xf32> -> vector<8x2xf32>
    %c0_11 = arith.constant 0 : index
    %c0_12 = arith.constant 0 : index
    %20 = vector.load %arg5[%c0_11, %c0_12] : memref<2x64xf32, #tpu.memory_space<vmem>>, vector<2x64xf32>
    %cst_13 = arith.constant dense<0.000000e+00> : vector<2x8xf32>
    %21 = tpu.matmul %20, %17, %cst_13 {dimension_numbers = #tpu.dot_dimension_numbers<[1], [1], [0], [0], [0, 0, 1, 0], [], []>} : vector<2x64xf32>, vector<8x64xf32>, vector<2x8xf32> -> vector<2x8xf32>
    %22 = vector.extract_strided_slice %17 {offsets = [0, 0], sizes = [8, 32], strides = [1, 1]} : vector<8x64xf32> to vector<8x32xf32>
    %cst_14 = arith.constant 0.000000e+00 : f32
    %23 = vector.broadcast %cst_14 : f32 to vector<8x8xf32>
    %c0_15 = arith.constant 0 : index
    %c0_16 = arith.constant 0 : index
    %24 = memref.load %arg6[%c0_15, %c0_16] : memref<3x5xf32, #tpu.memory_space<smem>>
    %cst_17 = arith.constant 0.000000e+00 : f32
    %25 = vector.broadcast %24 : f32 to vector<8x8xf32>
    %26 = vector.broadcast %cst_17 : f32 to vector<8x8xf32>
    %27 = arith.select %5, %25, %26 : vector<8x8xi1>, vector<8x8xf32>
    %28 = arith.addf %23, %27 : vector<8x8xf32>
    %c0_18 = arith.constant 0 : index
    %c1 = arith.constant 1 : index
    %29 = memref.load %arg6[%c0_18, %c1] : memref<3x5xf32, #tpu.memory_space<smem>>
    %cst_19 = arith.constant 0.000000e+00 : f32
    %30 = vector.broadcast %29 : f32 to vector<8x8xf32>
    %31 = vector.broadcast %cst_19 : f32 to vector<8x8xf32>
    %32 = arith.select %7, %30, %31 : vector<8x8xi1>, vector<8x8xf32>
    %33 = arith.addf %28, %32 : vector<8x8xf32>
    %c0_20 = arith.constant 0 : index
    %c2 = arith.constant 2 : index
    %34 = memref.load %arg6[%c0_20, %c2] : memref<3x5xf32, #tpu.memory_space<smem>>
    %cst_21 = arith.constant 0.000000e+00 : f32
    %35 = vector.broadcast %34 : f32 to vector<8x8xf32>
    %36 = vector.broadcast %cst_21 : f32 to vector<8x8xf32>
    %37 = arith.select %9, %35, %36 : vector<8x8xi1>, vector<8x8xf32>
    %38 = arith.addf %33, %37 : vector<8x8xf32>
    %c0_22 = arith.constant 0 : index
    %c3 = arith.constant 3 : index
    %39 = memref.load %arg6[%c0_22, %c3] : memref<3x5xf32, #tpu.memory_space<smem>>
    %cst_23 = arith.constant 0.000000e+00 : f32
    %40 = vector.broadcast %39 : f32 to vector<8x8xf32>
    %41 = vector.broadcast %cst_23 : f32 to vector<8x8xf32>
    %42 = arith.select %11, %40, %41 : vector<8x8xi1>, vector<8x8xf32>
    %43 = arith.addf %38, %42 : vector<8x8xf32>
    %c0_24 = arith.constant 0 : index
    %c4 = arith.constant 4 : index
    %44 = memref.load %arg6[%c0_24, %c4] : memref<3x5xf32, #tpu.memory_space<smem>>
    %cst_25 = arith.constant 0.000000e+00 : f32
    %45 = vector.broadcast %44 : f32 to vector<8x8xf32>
    %46 = vector.broadcast %cst_25 : f32 to vector<8x8xf32>
    %47 = arith.select %13, %45, %46 : vector<8x8xi1>, vector<8x8xf32>
    %48 = arith.addf %43, %47 : vector<8x8xf32>
    %49 = vector.extract_strided_slice %19 {offsets = [0, 0], sizes = [8, 1], strides = [1, 1]} : vector<8x2xf32> to vector<8x1xf32>
    %50 = vector.extract_strided_slice %21 {offsets = [0, 0], sizes = [1, 8], strides = [1, 1]} : vector<2x8xf32> to vector<1x8xf32>
    %51 = vector.broadcast %49 : vector<8x1xf32> to vector<8x8xf32>
    %52 = vector.broadcast %50 : vector<1x8xf32> to vector<8x8xf32>
    %53 = arith.addf %51, %52 : vector<8x8xf32>
    %54 = arith.addf %53, %48 : vector<8x8xf32>
    %cst_26 = arith.constant 0.000000e+00 : f32
    %55 = vector.broadcast %cst_26 : f32 to vector<8x8xf32>
    %56 = arith.cmpf ogt, %54, %55 : vector<8x8xf32>
    %cst_27 = arith.constant 2.000000e-01 : f32
    %57 = vector.broadcast %cst_27 : f32 to vector<8x8xf32>
    %58 = arith.mulf %57, %54 : vector<8x8xf32>
    %59 = arith.select %56, %54, %58 : vector<8x8xi1>, vector<8x8xf32>
    %cst_28 = arith.constant -9.000000e+15 : f32
    %60 = vector.broadcast %cst_28 : f32 to vector<8x8xf32>
    %61 = arith.select %15, %59, %60 : vector<8x8xi1>, vector<8x8xf32>
    %cst_29 = arith.constant dense<0xFF800000> : vector<8xf32>
    %62 = vector.multi_reduction <maximumf>, %61, %cst_29 [1] : vector<8x8xf32> to vector<8xf32>
    %63 = vector.shape_cast %62 : vector<8xf32> to vector<8x1xf32>
    %64 = vector.broadcast %63 : vector<8x1xf32> to vector<8x8xf32>
    %65 = arith.subf %61, %64 : vector<8x8xf32>
    %66 = math.exp %65 : vector<8x8xf32>
    %cst_30 = arith.constant dense<0.000000e+00> : vector<8xf32>
    %67 = vector.multi_reduction <add>, %66, %cst_30 [1] : vector<8x8xf32> to vector<8xf32>
    %68 = vector.shape_cast %67 : vector<8xf32> to vector<8x1xf32>
    %69 = tpu.reciprocal %68 {approx = true} : vector<8x1xf32> -> vector<8x1xf32>
    %70 = vector.broadcast %69 : vector<8x1xf32> to vector<8x8xf32>
    %71 = arith.mulf %66, %70 : vector<8x8xf32>
    %cst_31 = arith.constant dense<0.000000e+00> : vector<8x32xf32>
    %72 = tpu.matmul %71, %22, %cst_31 {dimension_numbers = #tpu.dot_dimension_numbers<[1], [0], [0], [1], [0, 0, 1, 1], [], []>} : vector<8x8xf32>, vector<8x32xf32>, vector<8x32xf32> -> vector<8x32xf32>
    %c0_32 = arith.constant 0 : index
    %c0_33 = arith.constant 0 : index
    %73 = vector.load %arg7[%c0_32, %c0_33] : memref<2x32xf32, #tpu.memory_space<vmem>>, vector<1x32xf32>
    %c0_34 = arith.constant 0 : index
    %c0_35 = arith.constant 0 : index
    %74 = vector.load %arg8[%c0_34, %c0_35] : memref<2x32xf32, #tpu.memory_space<vmem>>, vector<1x32xf32>
    %cst_36 = arith.constant dense<0.000000e+00> : vector<8xf32>
    %75 = vector.multi_reduction <add>, %72, %cst_36 [1] : vector<8x32xf32> to vector<8xf32>
    %76 = vector.shape_cast %75 : vector<8xf32> to vector<8x1xf32>
    %cst_37 = arith.constant 3.200000e+01 : f32
    %77 = vector.broadcast %cst_37 : f32 to vector<8x1xf32>
    %78 = arith.divf %76, %77 : vector<8x1xf32>
    %79 = vector.broadcast %78 : vector<8x1xf32> to vector<8x32xf32>
    %80 = arith.subf %72, %79 : vector<8x32xf32>
    %81 = arith.mulf %80, %80 : vector<8x32xf32>
    %cst_38 = arith.constant dense<0.000000e+00> : vector<8xf32>
    %82 = vector.multi_reduction <add>, %81, %cst_38 [1] : vector<8x32xf32> to vector<8xf32>
    %83 = vector.shape_cast %82 : vector<8xf32> to vector<8x1xf32>
    %cst_39 = arith.constant 3.200000e+01 : f32
    %84 = vector.broadcast %cst_39 : f32 to vector<8x1xf32>
    %85 = arith.divf %83, %84 : vector<8x1xf32>
    %86 = vector.broadcast %78 : vector<8x1xf32> to vector<8x32xf32>
    %87 = arith.subf %72, %86 : vector<8x32xf32>
    %cst_40 = arith.constant 9.99999974E-6 : f32
    %88 = vector.broadcast %cst_40 : f32 to vector<8x1xf32>
    %89 = arith.addf %85, %88 : vector<8x1xf32>
    %90 = math.rsqrt %89 : vector<8x1xf32>
    %91 = vector.broadcast %90 : vector<8x1xf32> to vector<8x32xf32>
    %92 = arith.mulf %87, %91 : vector<8x32xf32>
    %93 = vector.broadcast %73 : vector<1x32xf32> to vector<8x32xf32>
    %94 = arith.mulf %92, %93 : vector<8x32xf32>
    %95 = vector.broadcast %74 : vector<1x32xf32> to vector<8x32xf32>
    %96 = arith.addf %94, %95 : vector<8x32xf32>
    %cst_41 = arith.constant 5.000000e-01 : f32
    %97 = vector.broadcast %cst_41 : f32 to vector<8x32xf32>
    %98 = arith.mulf %97, %96 : vector<8x32xf32>
    %cst_42 = arith.constant 0.707106769 : f32
    %99 = vector.broadcast %cst_42 : f32 to vector<8x32xf32>
    %100 = arith.mulf %96, %99 : vector<8x32xf32>
    %cst_43 = arith.constant 0.000000e+00 : f32
    %101 = vector.broadcast %cst_43 : f32 to vector<8x32xf32>
    %102 = arith.cmpf oge, %100, %101 : vector<8x32xf32>
    %cst_44 = arith.constant 1.000000e+00 : f32
    %cst_45 = arith.constant -1.000000e+00 : f32
    %103 = vector.broadcast %cst_44 : f32 to vector<8x32xf32>
    %104 = vector.broadcast %cst_45 : f32 to vector<8x32xf32>
    %105 = arith.select %102, %103, %104 : vector<8x32xi1>, vector<8x32xf32>
    %106 = math.absf %100 : vector<8x32xf32>
    %cst_46 = arith.constant 0.327591091 : f32
    %107 = vector.broadcast %cst_46 : f32 to vector<8x32xf32>
    %108 = arith.mulf %107, %106 : vector<8x32xf32>
    %cst_47 = arith.constant 1.000000e+00 : f32
    %109 = vector.broadcast %cst_47 : f32 to vector<8x32xf32>
    %110 = arith.addf %109, %108 : vector<8x32xf32>
    %cst_48 = arith.constant 1.000000e+00 : f32
    %111 = vector.broadcast %cst_48 : f32 to vector<8x32xf32>
    %112 = arith.divf %111, %110 : vector<8x32xf32>
    %cst_49 = arith.constant 1.06140542 : f32
    %113 = vector.broadcast %cst_49 : f32 to vector<8x32xf32>
    %114 = arith.mulf %113, %112 : vector<8x32xf32>
    %cst_50 = arith.constant -1.45315206 : f32
    %115 = vector.broadcast %cst_50 : f32 to vector<8x32xf32>
    %116 = arith.addf %114, %115 : vector<8x32xf32>
    %117 = arith.mulf %116, %112 : vector<8x32xf32>
    %cst_51 = arith.constant 1.42141378 : f32
    %118 = vector.broadcast %cst_51 : f32 to vector<8x32xf32>
    %119 = arith.addf %117, %118 : vector<8x32xf32>
    %120 = arith.mulf %119, %112 : vector<8x32xf32>
    %cst_52 = arith.constant -0.284496725 : f32
    %121 = vector.broadcast %cst_52 : f32 to vector<8x32xf32>
    %122 = arith.addf %120, %121 : vector<8x32xf32>
    %123 = arith.mulf %122, %112 : vector<8x32xf32>
    %cst_53 = arith.constant 0.254829586 : f32
    %124 = vector.broadcast %cst_53 : f32 to vector<8x32xf32>
    %125 = arith.addf %123, %124 : vector<8x32xf32>
    %126 = arith.mulf %125, %112 : vector<8x32xf32>
    %cst_54 = arith.constant 0.000000e+00 : f32
    %127 = vector.broadcast %cst_54 : f32 to vector<8x32xf32>
    %128 = arith.subf %127, %106 : vector<8x32xf32>
    %129 = arith.mulf %128, %106 : vector<8x32xf32>
    %130 = math.exp %129 : vector<8x32xf32>
    %131 = arith.mulf %126, %130 : vector<8x32xf32>
    %cst_55 = arith.constant 1.000000e+00 : f32
    %132 = vector.broadcast %cst_55 : f32 to vector<8x32xf32>
    %133 = arith.subf %132, %131 : vector<8x32xf32>
    %134 = arith.mulf %105, %133 : vector<8x32xf32>
    %cst_56 = arith.constant 1.000000e+00 : f32
    %135 = vector.broadcast %cst_56 : f32 to vector<8x32xf32>
    %136 = arith.addf %135, %134 : vector<8x32xf32>
    %137 = arith.mulf %98, %136 : vector<8x32xf32>
    %138 = vector.extract_strided_slice %17 {offsets = [0, 32], sizes = [8, 32], strides = [1, 1]} : vector<8x64xf32> to vector<8x32xf32>
    %cst_57 = arith.constant 0.000000e+00 : f32
    %139 = vector.broadcast %cst_57 : f32 to vector<8x8xf32>
    %c1_58 = arith.constant 1 : index
    %c0_59 = arith.constant 0 : index
    %140 = memref.load %arg6[%c1_58, %c0_59] : memref<3x5xf32, #tpu.memory_space<smem>>
    %cst_60 = arith.constant 0.000000e+00 : f32
    %141 = vector.broadcast %140 : f32 to vector<8x8xf32>
    %142 = vector.broadcast %cst_60 : f32 to vector<8x8xf32>
    %143 = arith.select %5, %141, %142 : vector<8x8xi1>, vector<8x8xf32>
    %144 = arith.addf %139, %143 : vector<8x8xf32>
    %c1_61 = arith.constant 1 : index
    %c1_62 = arith.constant 1 : index
    %145 = memref.load %arg6[%c1_61, %c1_62] : memref<3x5xf32, #tpu.memory_space<smem>>
    %cst_63 = arith.constant 0.000000e+00 : f32
    %146 = vector.broadcast %145 : f32 to vector<8x8xf32>
    %147 = vector.broadcast %cst_63 : f32 to vector<8x8xf32>
    %148 = arith.select %7, %146, %147 : vector<8x8xi1>, vector<8x8xf32>
    %149 = arith.addf %144, %148 : vector<8x8xf32>
    %c1_64 = arith.constant 1 : index
    %c2_65 = arith.constant 2 : index
    %150 = memref.load %arg6[%c1_64, %c2_65] : memref<3x5xf32, #tpu.memory_space<smem>>
    %cst_66 = arith.constant 0.000000e+00 : f32
    %151 = vector.broadcast %150 : f32 to vector<8x8xf32>
    %152 = vector.broadcast %cst_66 : f32 to vector<8x8xf32>
    %153 = arith.select %9, %151, %152 : vector<8x8xi1>, vector<8x8xf32>
    %154 = arith.addf %149, %153 : vector<8x8xf32>
    %c1_67 = arith.constant 1 : index
    %c3_68 = arith.constant 3 : index
    %155 = memref.load %arg6[%c1_67, %c3_68] : memref<3x5xf32, #tpu.memory_space<smem>>
    %cst_69 = arith.constant 0.000000e+00 : f32
    %156 = vector.broadcast %155 : f32 to vector<8x8xf32>
    %157 = vector.broadcast %cst_69 : f32 to vector<8x8xf32>
    %158 = arith.select %11, %156, %157 : vector<8x8xi1>, vector<8x8xf32>
    %159 = arith.addf %154, %158 : vector<8x8xf32>
    %c1_70 = arith.constant 1 : index
    %c4_71 = arith.constant 4 : index
    %160 = memref.load %arg6[%c1_70, %c4_71] : memref<3x5xf32, #tpu.memory_space<smem>>
    %cst_72 = arith.constant 0.000000e+00 : f32
    %161 = vector.broadcast %160 : f32 to vector<8x8xf32>
    %162 = vector.broadcast %cst_72 : f32 to vector<8x8xf32>
    %163 = arith.select %13, %161, %162 : vector<8x8xi1>, vector<8x8xf32>
    %164 = arith.addf %159, %163 : vector<8x8xf32>
    %165 = vector.extract_strided_slice %19 {offsets = [0, 1], sizes = [8, 1], strides = [1, 1]} : vector<8x2xf32> to vector<8x1xf32>
    %166 = vector.extract_strided_slice %21 {offsets = [1, 0], sizes = [1, 8], strides = [1, 1]} : vector<2x8xf32> to vector<1x8xf32>
    %167 = vector.broadcast %165 : vector<8x1xf32> to vector<8x8xf32>
    %168 = vector.broadcast %166 : vector<1x8xf32> to vector<8x8xf32>
    %169 = arith.addf %167, %168 : vector<8x8xf32>
    %170 = arith.addf %169, %164 : vector<8x8xf32>
    %cst_73 = arith.constant 0.000000e+00 : f32
    %171 = vector.broadcast %cst_73 : f32 to vector<8x8xf32>
    %172 = arith.cmpf ogt, %170, %171 : vector<8x8xf32>
    %cst_74 = arith.constant 2.000000e-01 : f32
    %173 = vector.broadcast %cst_74 : f32 to vector<8x8xf32>
    %174 = arith.mulf %173, %170 : vector<8x8xf32>
    %175 = arith.select %172, %170, %174 : vector<8x8xi1>, vector<8x8xf32>
    %cst_75 = arith.constant -9.000000e+15 : f32
    %176 = vector.broadcast %cst_75 : f32 to vector<8x8xf32>
    %177 = arith.select %15, %175, %176 : vector<8x8xi1>, vector<8x8xf32>
    %cst_76 = arith.constant dense<0xFF800000> : vector<8xf32>
    %178 = vector.multi_reduction <maximumf>, %177, %cst_76 [1] : vector<8x8xf32> to vector<8xf32>
    %179 = vector.shape_cast %178 : vector<8xf32> to vector<8x1xf32>
    %180 = vector.broadcast %179 : vector<8x1xf32> to vector<8x8xf32>
    %181 = arith.subf %177, %180 : vector<8x8xf32>
    %182 = math.exp %181 : vector<8x8xf32>
    %cst_77 = arith.constant dense<0.000000e+00> : vector<8xf32>
    %183 = vector.multi_reduction <add>, %182, %cst_77 [1] : vector<8x8xf32> to vector<8xf32>
    %184 = vector.shape_cast %183 : vector<8xf32> to vector<8x1xf32>
    %185 = tpu.reciprocal %184 {approx = true} : vector<8x1xf32> -> vector<8x1xf32>
    %186 = vector.broadcast %185 : vector<8x1xf32> to vector<8x8xf32>
    %187 = arith.mulf %182, %186 : vector<8x8xf32>
    %cst_78 = arith.constant dense<0.000000e+00> : vector<8x32xf32>
    %188 = tpu.matmul %187, %138, %cst_78 {dimension_numbers = #tpu.dot_dimension_numbers<[1], [0], [0], [1], [0, 0, 1, 1], [], []>} : vector<8x8xf32>, vector<8x32xf32>, vector<8x32xf32> -> vector<8x32xf32>
    %c1_79 = arith.constant 1 : index
    %c0_80 = arith.constant 0 : index
    %189 = vector.load %arg7[%c1_79, %c0_80] : memref<2x32xf32, #tpu.memory_space<vmem>>, vector<1x32xf32>
    %c1_81 = arith.constant 1 : index
    %c0_82 = arith.constant 0 : index
    %190 = vector.load %arg8[%c1_81, %c0_82] : memref<2x32xf32, #tpu.memory_space<vmem>>, vector<1x32xf32>
    %cst_83 = arith.constant dense<0.000000e+00> : vector<8xf32>
    %191 = vector.multi_reduction <add>, %188, %cst_83 [1] : vector<8x32xf32> to vector<8xf32>
    %192 = vector.shape_cast %191 : vector<8xf32> to vector<8x1xf32>
    %cst_84 = arith.constant 3.200000e+01 : f32
    %193 = vector.broadcast %cst_84 : f32 to vector<8x1xf32>
    %194 = arith.divf %192, %193 : vector<8x1xf32>
    %195 = vector.broadcast %194 : vector<8x1xf32> to vector<8x32xf32>
    %196 = arith.subf %188, %195 : vector<8x32xf32>
    %197 = arith.mulf %196, %196 : vector<8x32xf32>
    %cst_85 = arith.constant dense<0.000000e+00> : vector<8xf32>
    %198 = vector.multi_reduction <add>, %197, %cst_85 [1] : vector<8x32xf32> to vector<8xf32>
    %199 = vector.shape_cast %198 : vector<8xf32> to vector<8x1xf32>
    %cst_86 = arith.constant 3.200000e+01 : f32
    %200 = vector.broadcast %cst_86 : f32 to vector<8x1xf32>
    %201 = arith.divf %199, %200 : vector<8x1xf32>
    %202 = vector.broadcast %194 : vector<8x1xf32> to vector<8x32xf32>
    %203 = arith.subf %188, %202 : vector<8x32xf32>
    %cst_87 = arith.constant 9.99999974E-6 : f32
    %204 = vector.broadcast %cst_87 : f32 to vector<8x1xf32>
    %205 = arith.addf %201, %204 : vector<8x1xf32>
    %206 = math.rsqrt %205 : vector<8x1xf32>
    %207 = vector.broadcast %206 : vector<8x1xf32> to vector<8x32xf32>
    %208 = arith.mulf %203, %207 : vector<8x32xf32>
    %209 = vector.broadcast %189 : vector<1x32xf32> to vector<8x32xf32>
    %210 = arith.mulf %208, %209 : vector<8x32xf32>
    %211 = vector.broadcast %190 : vector<1x32xf32> to vector<8x32xf32>
    %212 = arith.addf %210, %211 : vector<8x32xf32>
    %cst_88 = arith.constant 5.000000e-01 : f32
    %213 = vector.broadcast %cst_88 : f32 to vector<8x32xf32>
    %214 = arith.mulf %213, %212 : vector<8x32xf32>
    %cst_89 = arith.constant 0.707106769 : f32
    %215 = vector.broadcast %cst_89 : f32 to vector<8x32xf32>
    %216 = arith.mulf %212, %215 : vector<8x32xf32>
    %cst_90 = arith.constant 0.000000e+00 : f32
    %217 = vector.broadcast %cst_90 : f32 to vector<8x32xf32>
    %218 = arith.cmpf oge, %216, %217 : vector<8x32xf32>
    %cst_91 = arith.constant 1.000000e+00 : f32
    %cst_92 = arith.constant -1.000000e+00 : f32
    %219 = vector.broadcast %cst_91 : f32 to vector<8x32xf32>
    %220 = vector.broadcast %cst_92 : f32 to vector<8x32xf32>
    %221 = arith.select %218, %219, %220 : vector<8x32xi1>, vector<8x32xf32>
    %222 = math.absf %216 : vector<8x32xf32>
    %cst_93 = arith.constant 0.327591091 : f32
    %223 = vector.broadcast %cst_93 : f32 to vector<8x32xf32>
    %224 = arith.mulf %223, %222 : vector<8x32xf32>
    %cst_94 = arith.constant 1.000000e+00 : f32
    %225 = vector.broadcast %cst_94 : f32 to vector<8x32xf32>
    %226 = arith.addf %225, %224 : vector<8x32xf32>
    %cst_95 = arith.constant 1.000000e+00 : f32
    %227 = vector.broadcast %cst_95 : f32 to vector<8x32xf32>
    %228 = arith.divf %227, %226 : vector<8x32xf32>
    %cst_96 = arith.constant 1.06140542 : f32
    %229 = vector.broadcast %cst_96 : f32 to vector<8x32xf32>
    %230 = arith.mulf %229, %228 : vector<8x32xf32>
    %cst_97 = arith.constant -1.45315206 : f32
    %231 = vector.broadcast %cst_97 : f32 to vector<8x32xf32>
    %232 = arith.addf %230, %231 : vector<8x32xf32>
    %233 = arith.mulf %232, %228 : vector<8x32xf32>
    %cst_98 = arith.constant 1.42141378 : f32
    %234 = vector.broadcast %cst_98 : f32 to vector<8x32xf32>
    %235 = arith.addf %233, %234 : vector<8x32xf32>
    %236 = arith.mulf %235, %228 : vector<8x32xf32>
    %cst_99 = arith.constant -0.284496725 : f32
    %237 = vector.broadcast %cst_99 : f32 to vector<8x32xf32>
    %238 = arith.addf %236, %237 : vector<8x32xf32>
    %239 = arith.mulf %238, %228 : vector<8x32xf32>
    %cst_100 = arith.constant 0.254829586 : f32
    %240 = vector.broadcast %cst_100 : f32 to vector<8x32xf32>
    %241 = arith.addf %239, %240 : vector<8x32xf32>
    %242 = arith.mulf %241, %228 : vector<8x32xf32>
    %cst_101 = arith.constant 0.000000e+00 : f32
    %243 = vector.broadcast %cst_101 : f32 to vector<8x32xf32>
    %244 = arith.subf %243, %222 : vector<8x32xf32>
    %245 = arith.mulf %244, %222 : vector<8x32xf32>
    %246 = math.exp %245 : vector<8x32xf32>
    %247 = arith.mulf %242, %246 : vector<8x32xf32>
    %cst_102 = arith.constant 1.000000e+00 : f32
    %248 = vector.broadcast %cst_102 : f32 to vector<8x32xf32>
    %249 = arith.subf %248, %247 : vector<8x32xf32>
    %250 = arith.mulf %221, %249 : vector<8x32xf32>
    %cst_103 = arith.constant 1.000000e+00 : f32
    %251 = vector.broadcast %cst_103 : f32 to vector<8x32xf32>
    %252 = arith.addf %251, %250 : vector<8x32xf32>
    %253 = arith.mulf %214, %252 : vector<8x32xf32>
    %254 = tpu.concatenate %137, %253 in 1 : vector<8x32xf32>, vector<8x32xf32> -> vector<8x64xf32>
    %c0_104 = arith.constant 0 : index
    %c0_105 = arith.constant 0 : index
    %255 = vector.load %arg9[%c0_104, %c0_105] : memref<64x32xf32, #tpu.memory_space<vmem>>, vector<64x32xf32>
    %cst_106 = arith.constant dense<0.000000e+00> : vector<8x32xf32>
    %256 = tpu.matmul %254, %255, %cst_106 {dimension_numbers = #tpu.dot_dimension_numbers<[1], [0], [0], [1], [0, 0, 1, 1], [], []>} : vector<8x64xf32>, vector<64x32xf32>, vector<8x32xf32> -> vector<8x32xf32>
    %c0_107 = arith.constant 0 : index
    %c0_108 = arith.constant 0 : index
    %257 = vector.load %arg10[%c0_107, %c0_108] : memref<32x1xf32, #tpu.memory_space<vmem>>, vector<32x1xf32>
    %cst_109 = arith.constant dense<0.000000e+00> : vector<8x1xf32>
    %258 = tpu.matmul %256, %257, %cst_109 {dimension_numbers = #tpu.dot_dimension_numbers<[1], [0], [0], [1], [0, 0, 1, 1], [], []>} : vector<8x32xf32>, vector<32x1xf32>, vector<8x1xf32> -> vector<8x1xf32>
    %c0_110 = arith.constant 0 : index
    %c0_111 = arith.constant 0 : index
    %259 = vector.load %arg11[%c0_110, %c0_111] : memref<1x32xf32, #tpu.memory_space<vmem>>, vector<1x32xf32>
    %cst_112 = arith.constant dense<0.000000e+00> : vector<1x8xf32>
    %260 = tpu.matmul %259, %256, %cst_112 {dimension_numbers = #tpu.dot_dimension_numbers<[1], [1], [0], [0], [0, 0, 1, 0], [], []>} : vector<1x32xf32>, vector<8x32xf32>, vector<1x8xf32> -> vector<1x8xf32>
    %cst_113 = arith.constant 0.000000e+00 : f32
    %261 = vector.broadcast %cst_113 : f32 to vector<8x8xf32>
    %c2_114 = arith.constant 2 : index
    %c0_115 = arith.constant 0 : index
    %262 = memref.load %arg6[%c2_114, %c0_115] : memref<3x5xf32, #tpu.memory_space<smem>>
    %cst_116 = arith.constant 0.000000e+00 : f32
    %263 = vector.broadcast %262 : f32 to vector<8x8xf32>
    %264 = vector.broadcast %cst_116 : f32 to vector<8x8xf32>
    %265 = arith.select %5, %263, %264 : vector<8x8xi1>, vector<8x8xf32>
    %266 = arith.addf %261, %265 : vector<8x8xf32>
    %c2_117 = arith.constant 2 : index
    %c1_118 = arith.constant 1 : index
    %267 = memref.load %arg6[%c2_117, %c1_118] : memref<3x5xf32, #tpu.memory_space<smem>>
    %cst_119 = arith.constant 0.000000e+00 : f32
    %268 = vector.broadcast %267 : f32 to vector<8x8xf32>
    %269 = vector.broadcast %cst_119 : f32 to vector<8x8xf32>
    %270 = arith.select %7, %268, %269 : vector<8x8xi1>, vector<8x8xf32>
    %271 = arith.addf %266, %270 : vector<8x8xf32>
    %c2_120 = arith.constant 2 : index
    %c2_121 = arith.constant 2 : index
    %272 = memref.load %arg6[%c2_120, %c2_121] : memref<3x5xf32, #tpu.memory_space<smem>>
    %cst_122 = arith.constant 0.000000e+00 : f32
    %273 = vector.broadcast %272 : f32 to vector<8x8xf32>
    %274 = vector.broadcast %cst_122 : f32 to vector<8x8xf32>
    %275 = arith.select %9, %273, %274 : vector<8x8xi1>, vector<8x8xf32>
    %276 = arith.addf %271, %275 : vector<8x8xf32>
    %c2_123 = arith.constant 2 : index
    %c3_124 = arith.constant 3 : index
    %277 = memref.load %arg6[%c2_123, %c3_124] : memref<3x5xf32, #tpu.memory_space<smem>>
    %cst_125 = arith.constant 0.000000e+00 : f32
    %278 = vector.broadcast %277 : f32 to vector<8x8xf32>
    %279 = vector.broadcast %cst_125 : f32 to vector<8x8xf32>
    %280 = arith.select %11, %278, %279 : vector<8x8xi1>, vector<8x8xf32>
    %281 = arith.addf %276, %280 : vector<8x8xf32>
    %c2_126 = arith.constant 2 : index
    %c4_127 = arith.constant 4 : index
    %282 = memref.load %arg6[%c2_126, %c4_127] : memref<3x5xf32, #tpu.memory_space<smem>>
    %cst_128 = arith.constant 0.000000e+00 : f32
    %283 = vector.broadcast %282 : f32 to vector<8x8xf32>
    %284 = vector.broadcast %cst_128 : f32 to vector<8x8xf32>
    %285 = arith.select %13, %283, %284 : vector<8x8xi1>, vector<8x8xf32>
    %286 = arith.addf %281, %285 : vector<8x8xf32>
    %287 = vector.broadcast %258 : vector<8x1xf32> to vector<8x8xf32>
    %288 = vector.broadcast %260 : vector<1x8xf32> to vector<8x8xf32>
    %289 = arith.addf %287, %288 : vector<8x8xf32>
    %290 = arith.addf %289, %286 : vector<8x8xf32>
    %cst_129 = arith.constant 0.000000e+00 : f32
    %291 = vector.broadcast %cst_129 : f32 to vector<8x8xf32>
    %292 = arith.cmpf ogt, %290, %291 : vector<8x8xf32>
    %cst_130 = arith.constant 2.000000e-01 : f32
    %293 = vector.broadcast %cst_130 : f32 to vector<8x8xf32>
    %294 = arith.mulf %293, %290 : vector<8x8xf32>
    %295 = arith.select %292, %290, %294 : vector<8x8xi1>, vector<8x8xf32>
    %cst_131 = arith.constant -9.000000e+15 : f32
    %296 = vector.broadcast %cst_131 : f32 to vector<8x8xf32>
    %297 = arith.select %15, %295, %296 : vector<8x8xi1>, vector<8x8xf32>
    %cst_132 = arith.constant dense<0xFF800000> : vector<8xf32>
    %298 = vector.multi_reduction <maximumf>, %297, %cst_132 [1] : vector<8x8xf32> to vector<8xf32>
    %299 = vector.shape_cast %298 : vector<8xf32> to vector<8x1xf32>
    %300 = vector.broadcast %299 : vector<8x1xf32> to vector<8x8xf32>
    %301 = arith.subf %297, %300 : vector<8x8xf32>
    %302 = math.exp %301 : vector<8x8xf32>
    %cst_133 = arith.constant dense<0.000000e+00> : vector<8xf32>
    %303 = vector.multi_reduction <add>, %302, %cst_133 [1] : vector<8x8xf32> to vector<8xf32>
    %304 = vector.shape_cast %303 : vector<8xf32> to vector<8x1xf32>
    %305 = tpu.reciprocal %304 {approx = true} : vector<8x1xf32> -> vector<8x1xf32>
    %306 = vector.broadcast %305 : vector<8x1xf32> to vector<8x8xf32>
    %307 = arith.mulf %302, %306 : vector<8x8xf32>
    %cst_134 = arith.constant dense<0.000000e+00> : vector<8x32xf32>
    %308 = tpu.matmul %307, %256, %cst_134 {dimension_numbers = #tpu.dot_dimension_numbers<[1], [0], [0], [1], [0, 0, 1, 1], [], []>} : vector<8x8xf32>, vector<8x32xf32>, vector<8x32xf32> -> vector<8x32xf32>
    %c0_135 = arith.constant 0 : index
    %c0_136 = arith.constant 0 : index
    %309 = vector.load %arg12[%c0_135, %c0_136] : memref<1x32xf32, #tpu.memory_space<vmem>>, vector<1x32xf32>
    %c0_137 = arith.constant 0 : index
    %c0_138 = arith.constant 0 : index
    %310 = vector.load %arg13[%c0_137, %c0_138] : memref<1x32xf32, #tpu.memory_space<vmem>>, vector<1x32xf32>
    %cst_139 = arith.constant dense<0.000000e+00> : vector<8xf32>
    %311 = vector.multi_reduction <add>, %308, %cst_139 [1] : vector<8x32xf32> to vector<8xf32>
    %312 = vector.shape_cast %311 : vector<8xf32> to vector<8x1xf32>
    %cst_140 = arith.constant 3.200000e+01 : f32
    %313 = vector.broadcast %cst_140 : f32 to vector<8x1xf32>
    %314 = arith.divf %312, %313 : vector<8x1xf32>
    %315 = vector.broadcast %314 : vector<8x1xf32> to vector<8x32xf32>
    %316 = arith.subf %308, %315 : vector<8x32xf32>
    %317 = arith.mulf %316, %316 : vector<8x32xf32>
    %cst_141 = arith.constant dense<0.000000e+00> : vector<8xf32>
    %318 = vector.multi_reduction <add>, %317, %cst_141 [1] : vector<8x32xf32> to vector<8xf32>
    %319 = vector.shape_cast %318 : vector<8xf32> to vector<8x1xf32>
    %cst_142 = arith.constant 3.200000e+01 : f32
    %320 = vector.broadcast %cst_142 : f32 to vector<8x1xf32>
    %321 = arith.divf %319, %320 : vector<8x1xf32>
    %322 = vector.broadcast %314 : vector<8x1xf32> to vector<8x32xf32>
    %323 = arith.subf %308, %322 : vector<8x32xf32>
    %cst_143 = arith.constant 9.99999974E-6 : f32
    %324 = vector.broadcast %cst_143 : f32 to vector<8x1xf32>
    %325 = arith.addf %321, %324 : vector<8x1xf32>
    %326 = math.rsqrt %325 : vector<8x1xf32>
    %327 = vector.broadcast %326 : vector<8x1xf32> to vector<8x32xf32>
    %328 = arith.mulf %323, %327 : vector<8x32xf32>
    %329 = vector.broadcast %309 : vector<1x32xf32> to vector<8x32xf32>
    %330 = arith.mulf %328, %329 : vector<8x32xf32>
    %331 = vector.broadcast %310 : vector<1x32xf32> to vector<8x32xf32>
    %332 = arith.addf %330, %331 : vector<8x32xf32>
    %cst_144 = arith.constant 5.000000e-01 : f32
    %333 = vector.broadcast %cst_144 : f32 to vector<8x32xf32>
    %334 = arith.mulf %333, %332 : vector<8x32xf32>
    %cst_145 = arith.constant 0.707106769 : f32
    %335 = vector.broadcast %cst_145 : f32 to vector<8x32xf32>
    %336 = arith.mulf %332, %335 : vector<8x32xf32>
    %cst_146 = arith.constant 0.000000e+00 : f32
    %337 = vector.broadcast %cst_146 : f32 to vector<8x32xf32>
    %338 = arith.cmpf oge, %336, %337 : vector<8x32xf32>
    %cst_147 = arith.constant 1.000000e+00 : f32
    %cst_148 = arith.constant -1.000000e+00 : f32
    %339 = vector.broadcast %cst_147 : f32 to vector<8x32xf32>
    %340 = vector.broadcast %cst_148 : f32 to vector<8x32xf32>
    %341 = arith.select %338, %339, %340 : vector<8x32xi1>, vector<8x32xf32>
    %342 = math.absf %336 : vector<8x32xf32>
    %cst_149 = arith.constant 0.327591091 : f32
    %343 = vector.broadcast %cst_149 : f32 to vector<8x32xf32>
    %344 = arith.mulf %343, %342 : vector<8x32xf32>
    %cst_150 = arith.constant 1.000000e+00 : f32
    %345 = vector.broadcast %cst_150 : f32 to vector<8x32xf32>
    %346 = arith.addf %345, %344 : vector<8x32xf32>
    %cst_151 = arith.constant 1.000000e+00 : f32
    %347 = vector.broadcast %cst_151 : f32 to vector<8x32xf32>
    %348 = arith.divf %347, %346 : vector<8x32xf32>
    %cst_152 = arith.constant 1.06140542 : f32
    %349 = vector.broadcast %cst_152 : f32 to vector<8x32xf32>
    %350 = arith.mulf %349, %348 : vector<8x32xf32>
    %cst_153 = arith.constant -1.45315206 : f32
    %351 = vector.broadcast %cst_153 : f32 to vector<8x32xf32>
    %352 = arith.addf %350, %351 : vector<8x32xf32>
    %353 = arith.mulf %352, %348 : vector<8x32xf32>
    %cst_154 = arith.constant 1.42141378 : f32
    %354 = vector.broadcast %cst_154 : f32 to vector<8x32xf32>
    %355 = arith.addf %353, %354 : vector<8x32xf32>
    %356 = arith.mulf %355, %348 : vector<8x32xf32>
    %cst_155 = arith.constant -0.284496725 : f32
    %357 = vector.broadcast %cst_155 : f32 to vector<8x32xf32>
    %358 = arith.addf %356, %357 : vector<8x32xf32>
    %359 = arith.mulf %358, %348 : vector<8x32xf32>
    %cst_156 = arith.constant 0.254829586 : f32
    %360 = vector.broadcast %cst_156 : f32 to vector<8x32xf32>
    %361 = arith.addf %359, %360 : vector<8x32xf32>
    %362 = arith.mulf %361, %348 : vector<8x32xf32>
    %cst_157 = arith.constant 0.000000e+00 : f32
    %363 = vector.broadcast %cst_157 : f32 to vector<8x32xf32>
    %364 = arith.subf %363, %342 : vector<8x32xf32>
    %365 = arith.mulf %364, %342 : vector<8x32xf32>
    %366 = math.exp %365 : vector<8x32xf32>
    %367 = arith.mulf %362, %366 : vector<8x32xf32>
    %cst_158 = arith.constant 1.000000e+00 : f32
    %368 = vector.broadcast %cst_158 : f32 to vector<8x32xf32>
    %369 = arith.subf %368, %367 : vector<8x32xf32>
    %370 = arith.mulf %341, %369 : vector<8x32xf32>
    %cst_159 = arith.constant 1.000000e+00 : f32
    %371 = vector.broadcast %cst_159 : f32 to vector<8x32xf32>
    %372 = arith.addf %371, %370 : vector<8x32xf32>
    %373 = arith.mulf %334, %372 : vector<8x32xf32>
    %c0_160 = arith.constant 0 : index
    %c0_161 = arith.constant 0 : index
    %374 = vector.load %arg14[%c0_160, %c0_161] : memref<32x32xf32, #tpu.memory_space<vmem>>, vector<32x32xf32>
    %cst_162 = arith.constant dense<0.000000e+00> : vector<8x32xf32>
    %375 = tpu.matmul %373, %374, %cst_162 {dimension_numbers = #tpu.dot_dimension_numbers<[1], [0], [0], [1], [0, 0, 1, 1], [], []>} : vector<8x32xf32>, vector<32x32xf32>, vector<8x32xf32> -> vector<8x32xf32>
    %c0_163 = arith.constant 0 : index
    %c0_164 = arith.constant 0 : index
    %376 = vector.load %arg15[%c0_163, %c0_164] : memref<1x32xf32, #tpu.memory_space<vmem>>, vector<1x32xf32>
    %377 = vector.broadcast %376 : vector<1x32xf32> to vector<8x32xf32>
    %378 = arith.addf %375, %377 : vector<8x32xf32>
    %379 = arith.addf %378, %1 : vector<8x32xf32>
    %c0_165 = arith.constant 0 : index
    %c0_166 = arith.constant 0 : index
    %380 = vector.load %arg16[%c0_165, %c0_166] : memref<1x32xf32, #tpu.memory_space<vmem>>, vector<1x32xf32>
    %c0_167 = arith.constant 0 : index
    %c0_168 = arith.constant 0 : index
    %381 = vector.load %arg17[%c0_167, %c0_168] : memref<1x32xf32, #tpu.memory_space<vmem>>, vector<1x32xf32>
    %cst_169 = arith.constant dense<0.000000e+00> : vector<8xf32>
    %382 = vector.multi_reduction <add>, %379, %cst_169 [1] : vector<8x32xf32> to vector<8xf32>
    %383 = vector.shape_cast %382 : vector<8xf32> to vector<8x1xf32>
    %cst_170 = arith.constant 3.200000e+01 : f32
    %384 = vector.broadcast %cst_170 : f32 to vector<8x1xf32>
    %385 = arith.divf %383, %384 : vector<8x1xf32>
    %386 = vector.broadcast %385 : vector<8x1xf32> to vector<8x32xf32>
    %387 = arith.subf %379, %386 : vector<8x32xf32>
    %388 = arith.mulf %387, %387 : vector<8x32xf32>
    %cst_171 = arith.constant dense<0.000000e+00> : vector<8xf32>
    %389 = vector.multi_reduction <add>, %388, %cst_171 [1] : vector<8x32xf32> to vector<8xf32>
    %390 = vector.shape_cast %389 : vector<8xf32> to vector<8x1xf32>
    %cst_172 = arith.constant 3.200000e+01 : f32
    %391 = vector.broadcast %cst_172 : f32 to vector<8x1xf32>
    %392 = arith.divf %390, %391 : vector<8x1xf32>
    %393 = vector.broadcast %385 : vector<8x1xf32> to vector<8x32xf32>
    %394 = arith.subf %379, %393 : vector<8x32xf32>
    %cst_173 = arith.constant 9.99999974E-6 : f32
    %395 = vector.broadcast %cst_173 : f32 to vector<8x1xf32>
    %396 = arith.addf %392, %395 : vector<8x1xf32>
    %397 = math.rsqrt %396 : vector<8x1xf32>
    %398 = vector.broadcast %397 : vector<8x1xf32> to vector<8x32xf32>
    %399 = arith.mulf %394, %398 : vector<8x32xf32>
    %400 = vector.broadcast %380 : vector<1x32xf32> to vector<8x32xf32>
    %401 = arith.mulf %399, %400 : vector<8x32xf32>
    %402 = vector.broadcast %381 : vector<1x32xf32> to vector<8x32xf32>
    %403 = arith.addf %401, %402 : vector<8x32xf32>
    %c0_174 = arith.constant 0 : index
    %c0_175 = arith.constant 0 : index
    %c0_176 = arith.constant 0 : index
    %404 = vector.load %arg18[%c0_174, %c0_175, %c0_176] : memref<1x8x32xf32, #tpu.memory_space<vmem>>, vector<1x8x32xf32>
    %405 = vector.shape_cast %404 : vector<1x8x32xf32> to vector<8x32xf32>
    %406 = vector.shape_cast %403 : vector<8x32xf32> to vector<1x8x32xf32>
    tpu.vector_store %arg18[%c0_174, %c0_175, %c0_176], %406 {strides = array<i32>} : memref<1x8x32xf32, #tpu.memory_space<vmem>>, vector<1x8x32xf32>,
    return
  }
  func.func @transform_0(%arg0: i32) -> (i32, i32, i32) {
    %c0_i32 = arith.constant 0 : i32
    %c0_i32_0 = arith.constant 0 : i32
    %c0_i32_1 = arith.constant 0 : i32
    return %arg0, %c0_i32, %c0_i32_0 : i32, i32, i32
  }
  func.func @transform_1(%arg0: i32) -> (i32, i32, i32) {
    %c0_i32 = arith.constant 0 : i32
    %c0_i32_0 = arith.constant 0 : i32
    %c0_i32_1 = arith.constant 0 : i32
    return %arg0, %c0_i32, %c0_i32_0 : i32, i32, i32
  }
  func.func @transform_2(%arg0: i32) -> (i32, i32) {
    %c0_i32 = arith.constant 0 : i32
    %c0_i32_0 = arith.constant 0 : i32
    %c0_i32_1 = arith.constant 0 : i32
    return %c0_i32, %c0_i32_0 : i32, i32
  }
  func.func @transform_3(%arg0: i32) -> (i32, i32) {
    %c0_i32 = arith.constant 0 : i32
    %c0_i32_0 = arith.constant 0 : i32
    %c0_i32_1 = arith.constant 0 : i32
    return %c0_i32, %c0_i32_0 : i32, i32
  }
  func.func @transform_4(%arg0: i32) -> (i32, i32) {
    %c0_i32 = arith.constant 0 : i32
    %c0_i32_0 = arith.constant 0 : i32
    %c0_i32_1 = arith.constant 0 : i32
    return %c0_i32, %c0_i32_0 : i32, i32
  }
  func.func @transform_5(%arg0: i32) -> (i32, i32) {
    %c0_i32 = arith.constant 0 : i32
    %c0_i32_0 = arith.constant 0 : i32
    %c0_i32_1 = arith.constant 0 : i32
    return %c0_i32, %c0_i32_0 : i32, i32
  }
  func.func @transform_6(%arg0: i32) -> (i32, i32) {
    %c0_i32 = arith.constant 0 : i32
    %c0_i32_0 = arith.constant 0 : i32
    %c0_i32_1 = arith.constant 0 : i32
    return %c0_i32, %c0_i32_0 : i32, i32
  }
  func.func @transform_7(%arg0: i32) -> (i32, i32) {
    %c0_i32 = arith.constant 0 : i32
    %c0_i32_0 = arith.constant 0 : i32
    %c0_i32_1 = arith.constant 0 : i32
    return %c0_i32, %c0_i32_0 : i32, i32
  }
  func.func @transform_8(%arg0: i32) -> (i32, i32) {
    %c0_i32 = arith.constant 0 : i32
    %c0_i32_0 = arith.constant 0 : i32
    %c0_i32_1 = arith.constant 0 : i32
    return %c0_i32, %c0_i32_0 : i32, i32
  }
  func.func @transform_9(%arg0: i32) -> (i32, i32) {
    %c0_i32 = arith.constant 0 : i32
    %c0_i32_0 = arith.constant 0 : i32
    %c0_i32_1 = arith.constant 0 : i32
    return %c0_i32, %c0_i32_0 : i32, i32
  }
  func.func @transform_10(%arg0: i32) -> (i32, i32) {
    %c0_i32 = arith.constant 0 : i32
    %c0_i32_0 = arith.constant 0 : i32
    %c0_i32_1 = arith.constant 0 : i32
    return %c0_i32, %c0_i32_0 : i32, i32
  }
  func.func @transform_11(%arg0: i32) -> (i32, i32) {
    %c0_i32 = arith.constant 0 : i32
    %c0_i32_0 = arith.constant 0 : i32
    %c0_i32_1 = arith.constant 0 : i32
    return %c0_i32, %c0_i32_0 : i32, i32
  }
  func.func @transform_12(%arg0: i32) -> (i32, i32) {
    %c0_i32 = arith.constant 0 : i32
    %c0_i32_0 = arith.constant 0 : i32
    %c0_i32_1 = arith.constant 0 : i32
    return %c0_i32, %c0_i32_0 : i32, i32
  }
  func.func @transform_13(%arg0: i32) -> (i32, i32) {
    %c0_i32 = arith.constant 0 : i32
    %c0_i32_0 = arith.constant 0 : i32
    %c0_i32_1 = arith.constant 0 : i32
    return %c0_i32, %c0_i32_0 : i32, i32
  }
  func.func @transform_14(%arg0: i32) -> (i32, i32) {
    %c0_i32 = arith.constant 0 : i32
    %c0_i32_0 = arith.constant 0 : i32
    %c0_i32_1 = arith.constant 0 : i32
    return %c0_i32, %c0_i32_0 : i32, i32
  }
  func.func @transform_15(%arg0: i32) -> (i32, i32) {
    %c0_i32 = arith.constant 0 : i32
    %c0_i32_0 = arith.constant 0 : i32
    %c0_i32_1 = arith.constant 0 : i32
    return %c0_i32, %c0_i32_0 : i32, i32
  }
  func.func @transform_16(%arg0: i32) -> (i32, i32) {
    %c0_i32 = arith.constant 0 : i32
    %c0_i32_0 = arith.constant 0 : i32
    %c0_i32_1 = arith.constant 0 : i32
    return %c0_i32, %c0_i32_0 : i32, i32
  }
  func.func @transform_17(%arg0: i32) -> (i32, i32, i32) {
    %c0_i32 = arith.constant 0 : i32
    %c0_i32_0 = arith.constant 0 : i32
    %c0_i32_1 = arith.constant 0 : i32
    return %arg0, %c0_i32, %c0_i32_0 : i32, i32, i32
  }
}

</mosaic_0001>

<bundles_post_ra>
// kernel: tpu_custom_call.1
= control target key start
LH: loop header
LB: loop body
LE: loop exit
PB: predicated region body
PF: predicated region fallthrough
CT: control target
= control target key end

     0   :  { %s2675_s0 = inlined_call_operand.vmem [shape: f32[2,8,32], index: 0, kind: input, shape index: {}]   ;;  %s2676_s1 = inlined_call_operand.vmem [shape: s32[2,8,8], index: 1, kind: input, shape index: {}]   ;;  %s2677_s2 = inlined_call_operand.vmem [shape: f32[32,64], index: 2, kind: input, shape index: {}]   ;;  %s2678_s3 = inlined_call_operand.vmem [shape: f32[64,2], index: 3, kind: input, shape index: {}]   ;;  %s2679_s4 = inlined_call_operand.vmem [shape: f32[2,64], index: 4, kind: input, shape index: {}]   ;;  %s2680_s5 = inlined_call_operand.vmem [shape: f32[3,5], index: 5, kind: input, shape index: {}]   ;;  %s2681_s6 = inlined_call_operand.vmem [shape: f32[2,32], index: 6, kind: input, shape index: {}]   ;;  %s2682_s7 = inlined_call_operand.vmem [shape: f32[2,32], index: 7, kind: input, shape index: {}]   ;;  %s2683_s8 = inlined_call_operand.vmem [shape: f32[64,32], index: 8, kind: input, shape index: {}]   ;;  %s2684_s9 = inlined_call_operand.vmem [shape: f32[32,1], index: 9, kind: input, shape index: {}]   ;;  %s2685_s10 = inlined_call_operand.vmem [shape: f32[1,32], index: 10, kind: input, shape index: {}]   ;;  %s2686_s11 = inlined_call_operand.vmem [shape: f32[1,32], index: 11, kind: input, shape index: {}]   ;;  %s2687_s12 = inlined_call_operand.vmem [shape: f32[1,32], index: 12, kind: input, shape index: {}]   ;;  %s2688_s13 = inlined_call_operand.vmem [shape: f32[32,32], index: 13, kind: input, shape index: {}]   ;;  %s2689_s14 = inlined_call_operand.vmem [shape: f32[1,32], index: 14, kind: input, shape index: {}]   ;;  %s2690_s15 = inlined_call_operand.vmem [shape: f32[1,32], index: 15, kind: input, shape index: {}]   ;;  %s2691_s16 = inlined_call_operand.vmem [shape: f32[1,32], index: 16, kind: input, shape index: {}]   ;;  %s2692_s17 = inlined_call_operand.hbm [shape: f32[2,8,32], index: 17, kind: output, shape index: {}]  }
   0x1   :  { %2696 = sst [smem:[#allocation11_spill]] %s2675_s0 }
   0x2   :  { %2697 = sst [smem:[#allocation12_spill]] %s2676_s1 }
   0x3   :  { %2698 = sst [smem:[#allocation13_spill]] %s2677_s2 }
   0x4   :  { %2699 = sst [smem:[#allocation14_spill]] %s2678_s3 }
   0x5   :  { %2700 = sst [smem:[#allocation15_spill]] %s2679_s4 }
   0x6   :  { %2701 = sst [smem:[#allocation16_spill]] %s2680_s5 }
   0x7   :  { %22 = vsyncpa [#allocation4], 0 }
   0x8   :  { %23 = vsyncpa [#allocation3], 0 }
   0x9   :  { %25 = vsyncpa [#allocation3 + $0x1], 0  ;;  %s2293_s24 = smov 0   ;;  %s2295_s25 = smov 0  }
   0xa   :  { %s2297_s26 = smov 0   ;;  %s2299_s27 = smov 0  }
   0xb LB: > { %2702 = sst [smem:[#allocation8_spill]] %s2187_s26  ;;  %s2314_s28 = sadd.s32 4294967295, %s2191_s27   ;;  %s2191_s27 = sphi %s2299_s27, %s2714_s27   ;;  %s2187_s26 = sphi %s2297_s26, %s2716_s26   ;;  %s2183_s25 = sphi %s2295_s25, %s2718_s25   ;;  %s2179_s24 = sphi %s2293_s24, %s2717_s24  }
   0xc   : > { %s1787_s29 = sadd.s32 4294967294, %s2191_s27   ;;  %s2318_s0 = sadd.s32 1, %s2191_s27  }
   0xd   : > { %2703 = sst [smem:[#allocation9_spill]] %s2318_s0  ;;  %s405_s30 = sadd.s32 1, %s2187_s26 }
   0xe   : > { %s402_s18 = ssub.s32 %s2191_s27, %s2318_s0  ;;  %p415_p0 = scmp.ne.s32.totalorder %s2187_s26, %s2183_s25 }
   0xf   : > { %p403_p1 = scmp.eq.s32.totalorder %s402_s18, 0  ;;  %p416_p2 = scmp.eq.s32.totalorder %s2314_s28, 1 }
  0x10   : > { %p421_p3 = scmp.ne.s32.totalorder %s2183_s25, %s2179_s24  ;;  %p422_p4 = scmp.eq.s32.totalorder %s1787_s29, 1 }
  0x11   : > { %s2329_s19 = scalar_select %p403_p1, %s2187_s26, %s405_s30  }
  0x12   : > { %p2331_p5 = por %p416_p2, %p415_p0  ;;  %p2335_p6 = por %p422_p4, %p421_p3 }
  0x13   : > { %2704 = sst [smem:[#allocation10_spill]] %s2329_s19  ;;  %p1788_p7 = scmp.ge.s32.totalorder %s2191_s27, 1 }
  0x14   : > { %p429_p8 = scmp.lt.s32.totalorder %s2191_s27, 3  ;;  %p2030_p9 = scmp.eq.s32.totalorder %s2314_s28, 0 }
  0x15   : > { %s2708_s5 = sld [smem:[#allocation16_spill]] }
  0x16   : > { %p2342_p10 = pnand %p1788_p7, %p429_p8 }
  0x18   : > { %p2022_p11 = pneg %p2342_p10 }
  0x1a   : > { %p2023_p12 = pnand %p2030_p9, %p2022_p11 }
  0x1b   : > { %s451_s29 = sshll.u32 %s2708_s5, 4  ;;  %s452_s29 = int_to_ptr.vmem [resolvable:$true] %s451_s29 }
  0x1c   : > { %s2110_s30 = scalar_lea.vmem %s452_s29, 64  ;;  %p2112_p0 = pneg %p2023_p12 }
  0x1d   : > { %p2111_p13 = scmp.ne.s32.totalorder %s452_s29, %s2110_s30  ;;  %p2118_p3 = scmp.lt.s32.totalorder %s452_s29, %s452_s29 }
  0x1e   : > { %p2119_p4 = scmp.lt.s32.totalorder %s2110_s30, %s2110_s30 }
  0x1f   : > { %p2113_p1 = pnand %p2112_p0, %p2111_p13 }
  0x20   : > { %p2120_p7 = por %p2119_p4, %p2118_p3 }
  0x21   : > { %p2114_p2 = pneg %p2113_p1 }
  0x23   : > { %p2121_p8 = pnand %p2120_p7, %p2114_p2 }
  0x25   : > { %2124 = shalt.err (!%p2121_p8)
}
  0x26   : > { %s2193_s18 = smov [#allocation2]   ;;  %511 = sbr.rel (%p2342_p10) target bundleno = 3620 (0xe24), region = 88 }
  0x27   : > { %2025 = dma.vmem_to_smem (!%p2023_p12), %s452_s29, 64, %s2193_s18, [#allocation4]  }
  0x2d   : > { %2170 = dma.done.wait (%p2030_p9), [#allocation4], 64  }
  0x2e   : > { %2172 = vsyncadd (%p2030_p9), [#allocation4], 4294967232 }
  0x2f   : > { %517 = sfence }
  0x30   : > { %s2709_s2 = sld [smem:[#allocation13_spill]]  ;;  %v2194_v3 = vmov 0.0|0.0   ;;  %vm2195_vm0 = vmmov 0   ;;  %v2196_v6 = vmov 0.0   ;;  %p567_p9 = scmp.lt.s32.totalorder %s2314_s28, 1  ;;  %vm587_vm1 = vcmask 261120  }
  0x31   : > { %1974 = vmatprep.subr.bf16.mxu0 %v2194_v3  ;;  %1886 = vmatprep.mubr.msk.f32.mxu0 %vm2195_vm0, %v2196_v6  ;;  %s2710_s3 = sld [smem:[#allocation14_spill]]  ;;  %v2197_v21 = vmov 0   ;;  %vm669_vm2 = vcmask 523264   ;;  %s2712_s4 = sld [smem:[#allocation15_spill]]  ;;  %v2198_v29 = vmov 1   ;;  %v842_v35 = vlaneseq }
  0x32   : > { %1980 = vmatprep.subr.bf16.mxu1 %v2194_v3  ;;  %1905 = vmatprep.mubr.msk.f32.mxu1 %vm2195_vm0, %v2196_v6  ;;  %s2391_s5 = scalar_select %p567_p9, %s2314_s28, 1  ;;  %vm852_vm10 = vcmask 64512  }
  0x33   : > { %2074 = vset.pattern.permute.xlu0 %v2197_v21  ;;  %2076 = vset.pattern.permute.xlu1 %v2197_v21  ;;  %s817_s18 = sld [smem:[#allocation2]]  ;;  %s1800_s21 = sld [smem:[#allocation2 + $0x1]]  ;;  %v2457_v41 = vshrl.u32 %v842_v35, 7 }
  0x34   : > { %s1794_s22 = sshll.u32 %s2391_s5, 3  ;;  %s2713_s29 = sld [smem:[#allocation12_spill]] }
  0x35   : > { %s1809_s0 = sld [smem:[#allocation2 + $0x82]]  ;;  %s1803_s5 = sld [smem:[#allocation2 + $0x4]]  ;;  %v844_v49 = vsub.s32 0, %v2457_v41  ;;  %v1016_v60 = vsub.s32 1, %v2457_v41 }
  0x36   : > { %v583_v0 = vld [vmem:[%s2709_s2] sm:$0xff]  ;;  %v584_v1 = vld [vmem:[%s2709_s2 + $0x8] sm:$0xff]  ;;  %v585_v2 = vld [vmem:[%s2709_s2 + $0x10] sm:$0xff] }
  0x37   : > { %v1975_v4 = vpack.c.bf16 %v584_v1, %v583_v0  ;;  %v586_v5 = vld [vmem:[%s2709_s2 + $0x18] sm:$0xff]  ;;  %v661_v7 = vld [vmem:[%s2710_s3] sm:$0xff]  ;;  %v662_v8 = vld [vmem:[%s2710_s3 + $0x8] sm:$0xff]  ;;  %s2711_s2 = sld [smem:[#allocation11_spill]] }
  0x38   : > { %v1981_v9 = vpack.c.bf16 %v662_v8, %v661_v7  ;;  %v663_v10 = vld [vmem:[%s2710_s3 + $0x10] sm:$0xff]  ;;  %v664_v11 = vld [vmem:[%s2710_s3 + $0x18] sm:$0xff]  ;;  %v1978_v12 = vpack.c.bf16 %v586_v5, %v585_v2  ;;  %v665_v14 = vld [vmem:[%s2710_s3 + $0x20] sm:$0xff] }
  0x39   : > { %1976 = vmatpush3.bf16.msra.mxu0 %v1975_v4  ;;  %v1984_v13 = vpack.c.bf16 %v664_v11, %v663_v10  ;;  %v666_v15 = vld [vmem:[%s2710_s3 + $0x28] sm:$0xff]  ;;  %v667_v18 = vld [vmem:[%s2710_s3 + $0x30] sm:$0xff]  ;;  %v668_v19 = vld [vmem:[%s2710_s3 + $0x38] sm:$0xff]  ;;  %s1808_s3 = sld [smem:[#allocation2 + $0x81]]  ;;  %v818_v31 = vstv %s817_s18  ;;  %s1811_s18 = sld [smem:[#allocation2 + $0x84]] }
  0x3a   : > { %1977 = vmatprep.subr.bf16.mxu0 %v2194_v3  ;;  %1982 = vmatpush3.bf16.msra.mxu1 %v1981_v9  ;;  %v1987_v17 = vpack.c.bf16 %v666_v15, %v665_v14  ;;  %v1990_v20 = vpack.c.bf16 %v668_v19, %v667_v18  ;;  %v743_v24 = vld [vmem:[%s2712_s4] sm:$0x3]  ;;  %s574_s19 = scalar_lea.vmem %s2713_s29, %s1794_s22  ;;  %v822_v32 = vstv %s1800_s21  ;;  %s1802_s4 = sld [smem:[#allocation2 + $0x3]] }
  0x3b   : > { %1983 = vmatprep.subr.bf16.mxu1 %v2194_v3  ;;  %v2445_v30 = vld [vmem:[%s574_s19] sm:$0xff]  ;;  %v999_v45 = vstv %s1809_s0  ;;  %v834_v50 = vstv %s1803_s5  ;;  %s2201_s21 = smov 32   ;;  %s1819_s5 = sld [smem:[#allocation2 + $0x100]] }
  0x3c   : > { %vm577_vm3 = vcmp.eq.s32.totalorder %v2445_v30, 0  ;;  %vm578_vm4 = vcmp.eq.s32.totalorder %v2445_v30, 1  ;;  %vm579_vm5 = vcmp.eq.s32.totalorder %v2445_v30, 2  ;;  %vm580_vm6 = vcmp.eq.s32.totalorder %v2445_v30, 3 }
  0x3d   : > { %s570_s26 = scalar_lea.vmem %s2711_s2, %s1794_s22  ;;  %1979 = vmatpush3.bf16.msra.mxu0 %v1978_v12  ;;  %s1801_s2 = sld [smem:[#allocation2 + $0x2]]  ;;  %v819_v33 = vsel %vm577_vm3, %v818_v31, 0.0  ;;  %v823_v34 = vsel %vm578_vm4, %v822_v32, 0.0  ;;  %vm581_vm7 = vcmp.eq.s32.totalorder %v2445_v30, 4  ;;  %v1000_v51 = vsel %vm579_vm5, %v999_v45, 0.0 }
  0x3e   : > { %v2407_v16 = vld [vmem:[%s570_s26] sm:$0xff]  ;;  %1985 = vmatpush3.bf16.msra.mxu1 %v1984_v13  ;;  %1908 = vmatprep.subr.mxu0 %v2196_v6  ;;  %s1807_s26 = sld [smem:[#allocation2 + $0x80]]  ;;  %s1810_s22 = sld [smem:[#allocation2 + $0x83]]  ;;  %v824_v39 = vadd.f32 %v823_v34, %v819_v33  ;;  %v835_v54 = vsel %vm581_vm7, %v834_v50, 0.0  ;;  %vm582_vm8 = vcmp.gt.s32.totalorder %v2445_v30, 0 }
  0x3f   : > { %1986 = vmatprep.subr.bf16.mxu1 %v2194_v3  ;;  %v995_v38 = vstv %s1808_s3  ;;  %v1007_v58 = vstv %s1811_s18  ;;  %s2199_s3 = smov 96   ;;  %s1821_s18 = sld [smem:[#allocation2 + $0x102]] }
  0x40   : > { %1887 = vmatmul.mubr.msk.f32.vlgmr.msra.gmra.mrb[0].mxu0 %vm587_vm1, %v2407_v16  ;;  %v830_v42 = vstv %s1802_s4  ;;  %v996_v44 = vsel %vm578_vm4, %v995_v38, 0.0  ;;  %v1008_v0 = vsel %vm581_vm7, %v1007_v58, 0.0  ;;  %v1171_v58 = vld [vmem:[%s2683_s8 + $0x18] sm:$0xff]  ;;  %s1823_s4 = sld [smem:[#allocation2 + $0x104]] }
  0x41   : > { %1910 = vmatprep.mubr.msk.f32.mxu0 %vm2195_vm0, %v2196_v6  ;;  %v831_v47 = vsel %vm580_vm6, %v830_v42, 0.0 }
  0x42   : > { %1988 = vmatpush3.bf16.msra.mxu1 %v1987_v17 }
  0x43   : > { %1989 = vmatprep.subr.bf16.mxu1 %v2194_v3  ;;  %v826_v36 = vstv %s1801_s2 }
  0x44   : > { %v991_v37 = vstv %s1807_s26  ;;  %v827_v40 = vsel %vm579_vm5, %v826_v36, 0.0  ;;  %v1003_v52 = vstv %s1810_s22  ;;  %s1820_s22 = sld [smem:[#allocation2 + $0x101]]  ;;  %s1832_s26 = sshll.u32 %s2314_s28, 7 }
  0x45   : > { %v992_v43 = vsel %vm577_vm3, %v991_v37, 0.0  ;;  %v828_v46 = vadd.f32 %v827_v40, %v824_v39  ;;  %v1004_v57 = vsel %vm580_vm6, %v1003_v52, 0.0  ;;  %s2202_s28 = smov [#allocation5]  }
  0x46   : > { %1991 = vmatpush3.bf16.msra.mxu1 %v1990_v20  ;;  %v997_v48 = vadd.f32 %v996_v44, %v992_v43 }
  0x47   : > { %1992 = vmatprep.subr.bf16.mxu1 %v2194_v3  ;;  %v832_v53 = vadd.f32 %v831_v47, %v828_v46 }
  0x48   : > { %v1001_v55 = vadd.f32 %v1000_v51, %v997_v48 }
  0x49   : > { %v836_v59 = vadd.f32 %v835_v54, %v832_v53  ;;  %v1168_v54 = vld [vmem:[%s2683_s8] sm:$0xff] }
  0x4a   : > { %v1005_v62 = vadd.f32 %v1004_v57, %v1001_v55  ;;  %v1169_v55 = vld [vmem:[%s2683_s8 + $0x8] sm:$0xff] }
  0x4b   : > { %v1993_v57 = vpack.c.bf16 %v1169_v55, %v1168_v54  ;;  %v1805_v55 = vld [vmem:[%s2681_s6] ss:$0 sm:$0xff] }
  0x4c   : > { %v1009_v4 = vadd.f32 %v1008_v0, %v1005_v62  ;;  %v1175_v0 = vld [vmem:[%s2683_s8 + $0x38] sm:$0xff] }
 0x113   : > { %v2423_v22 = vpop.f32.mrb[0].mxu0 }
 0x114   : > { %v1888_v23 = vpop.f32.mrb[1].mxu0  ;;  %1906 = vmatmul.mubr.msk.f32.vlgmr.msra.gmra.mrb[0].mxu1 %vm669_vm2, %v2423_v22  ;;  %1909 = vmatpush3.xpose.msk.msra.mxu0 %vm669_vm2, %v2423_v22 }
 0x115   : > { %1913 = vmatprep.subr.mxu0 %v2196_v6  ;;  %1939 = vmatprep.mubr.msk.f32.mxu1 %vm2195_vm0, %v2196_v6 }
 0x116   : > { %1994 = vmatpush3.bf16.msra.mxu1 %v1993_v57  ;;  %v1806_v57 = vld [vmem:[%s2682_s7] ss:$0 sm:$0xff] }
 0x117   : > { %1911 = vmatmul.mubr.msk.f32.vlgmr.msra.gmra.mrb[2].mxu0 %vm669_vm2, %v743_v24  ;;  %1995 = vmatprep.subr.bf16.mxu1 %v2194_v3 }
 0x118   : > { %1914 = vmatpush3.msra.mxu0 %v2423_v22  ;;  %1915 = vmatprep.mubr.msk.f32.mxu0 %vm2195_vm0, %v2196_v6 }
 0x119   : > { %1918 = vmatprep.subr.mxu0 %v2196_v6 }
 0x1e7   : > { %v739_v25 = vpop.f32.mrb[0].mxu1 }
 0x1e8   : > { %839 = vperm.xlu0 %2074, %v739_v25   ;;  %v1907_v26 = vpop.f32.mrb[1].mxu1 }
 0x1ea   : > { %v813_v27 = vpop.f32.mrb[2].mxu0 }
 0x1eb   : > { %v1912_v28 = vpop.f32.mrb[3].mxu0  ;;  %v845_v56 = vrot.slane %v813_v27, %v844_v49  ;;  %v1017_v2 = vrot.slane %v813_v27, %v1016_v60  ;;  %v1172_v60 = vld [vmem:[%s2683_s8 + $0x20] sm:$0xff] }
 0x1ec   : > { %2075 = vset.pattern.permute.xlu0 %v2198_v29 }
 0x1ed   : > { %1011 = vperm.xlu0 %2075, %v739_v25  }
 0x1f1   : > { %2077 = vset.pattern.permute.xlu0 %v2197_v21 }
 0x267   : > { %v840_v61 = vpop.permute.xlu0 %839 }
 0x268   : > { %v846_v63 = vadd.f32 %v845_v56, %v840_v61  ;;  %v1170_v56 = vld [vmem:[%s2683_s8 + $0x10] sm:$0xff]  ;;  %v1173_v61 = vld [vmem:[%s2683_s8 + $0x28] sm:$0xff] }
 0x269   : > { %v1999_v62 = vpack.c.bf16 %v1173_v61, %v1172_v60 }
 0x26a   : > { %v847_v1 = vadd.f32 %v846_v63, %v836_v59  ;;  %v1996_v59 = vpack.c.bf16 %v1171_v58, %v1170_v56  ;;  %v1174_v63 = vld [vmem:[%s2683_s8 + $0x30] sm:$0xff] }
 0x26c   : > { %v1012_v5 = vpop.permute.xlu0 %1011  ;;  %vm848_vm9 = vcmp.gt.f32.partialorder %v847_v1, 0.0  ;;  %v849_v7 = vmul.f32 0.2, %v847_v1  ;;  %1997 = vmatpush3.bf16.msra.mxu1 %v1996_v59 }
 0x26d   : > { %v1018_v8 = vadd.f32 %v1017_v2, %v1012_v5  ;;  %1998 = vmatprep.subr.bf16.mxu1 %v2194_v3 }
 0x26e   : > { %v850_v9 = vsel %vm848_vm9, %v847_v1, %v849_v7  ;;  %v2002_v1 = vpack.c.bf16 %v1175_v0, %v1174_v63 }
 0x26f   : > { %v1019_v10 = vadd.f32 %v1018_v8, %v1009_v4  ;;  %v851_v11 = vsel %vm582_vm8, %v850_v9, -9e+15  ;;  %v1813_v8 = vld [vmem:[%s2681_s6 + $0x1] ss:$0 sm:$0xff] }
 0x270   : > { %v853_v12 = vsel %vm852_vm10, %v851_v11, -inf  ;;  %2000 = vmatpush3.bf16.msra.mxu1 %v1999_v62 }
 0x271   : > { %854 = vmax.xlane.f32.xlu1 %v853_v12  ;;  %vm1020_vm11 = vcmp.gt.f32.partialorder %v1019_v10, 0.0  ;;  %v1021_v13 = vmul.f32 0.2, %v1019_v10  ;;  %2001 = vmatprep.subr.bf16.mxu1 %v2194_v3 }
 0x273   : > { %v1022_v14 = vsel %vm1020_vm11, %v1019_v10, %v1021_v13  ;;  %v1814_v10 = vld [vmem:[%s2682_s7 + $0x1] ss:$0 sm:$0xff] }
 0x274   : > { %v1023_v15 = vsel %vm582_vm8, %v1022_v14, -9e+15  ;;  %2003 = vmatpush3.bf16.msra.mxu1 %v2002_v1 }
 0x275   : > { %v1024_v17 = vsel %vm852_vm10, %v1023_v15, -inf  ;;  %2010 = vmatprep.subr.bf16.mxu1 %v2194_v3 }
 0x276   : > { %1025 = vmax.xlane.f32.xlu1 %v1024_v17 }
 0x2fe   : > { %v855_v18 = vpop.xlane.xlu1 %854 }
 0x2ff   : > { %v856_v19 = vsub.f32 %v851_v11, %v855_v18 }
 0x301   : > { %v857_v20 = vmul.f32 1.442695, %v856_v19 }
 0x303   : > { %2078 = vpow2.f32 %v857_v20  ;;  %v1026_v21 = vpop.xlane.xlu1 %1025 }
 0x304   : > { %v1027_v23 = vsub.f32 %v1023_v15, %v1026_v21 }
 0x306   : > { %v1028_v24 = vmul.f32 1.442695, %v1027_v23 }
 0x308   : > { %2080 = vpow2.f32 %v1028_v24 }
 0x30d   : > { %v2079_v25 = vpop.eup %2078 }
 0x30e   : > { %v859_v26 = vsel %vm852_vm10, %v2079_v25, 0.0 }
 0x30f   : > { %860 = vadd.xlane.f32.xlu1 %v859_v26 }
 0x312   : > { %v2081_v27 = vpop.eup %2080 }
 0x313   : > { %v1030_v28 = vsel %vm852_vm10, %v2081_v27, 0.0 }
 0x314   : > { %1031 = vadd.xlane.f32.xlu0 %v1030_v28 }
 0x320   : > { %1035 = vrot.lane.b32.xlu1 %v2423_v22, %s2199_s3  ;;  %s1822_s3 = sld [smem:[#allocation2 + $0x103]] }
 0x39c   : > { %v861_v29 = vpop.xlane.xlu1 %860 }
 0x39d   : > { %2082 = vrcp.f32 %v861_v29 }
 0x3a0   : > { %v1036_v34 = vpop.permute.xlu1 %1035 }
 0x3a1   : > { %v1032_v31 = vpop.xlane.xlu0 %1031 }
 0x3a2   : > { %2084 = vrcp.f32 %v1032_v31 }
 0x3a7   : > { %v2083_v32 = vpop.eup %2082 }
 0x3a8   : > { %v863_v33 = vmul.f32 %v2083_v32, %v2079_v25 }
 0x3aa   : > { %1916 = vmatmul.mubr.msk.f32.vlgmr.msra.gmra.mrb[4].mxu0 %vm852_vm10, %v863_v33  ;;  %v1249_v33 = vld [vmem:[%s2684_s9] sm:$0xff] }
 0x3ab   : > { %1919 = vmatpush3.msra.mxu0 %v1036_v34  ;;  %1920 = vmatprep.mubr.msk.f32.mxu0 %vm2195_vm0, %v2196_v6  ;;  %v1250_v34 = vld [vmem:[%s2684_s9 + $0x8] sm:$0xff] }
 0x3ac   : > { %v2085_v35 = vpop.eup %2084  ;;  %2004 = vmatprep.subr.bf16.mxu0 %v2194_v3 }
 0x3ad   : > { %v1034_v36 = vmul.f32 %v2085_v35, %v2081_v27  ;;  %v1251_v35 = vld [vmem:[%s2684_s9 + $0x10] sm:$0xff] }
 0x3af   : > { %1921 = vmatmul.mubr.msk.f32.vlgmr.msra.gmra.mrb[6].mxu0 %vm852_vm10, %v1034_v36 }
 0x3b0   : > { %1950 = vmatprep.mubr.msk.f32.mxu0 %vm2195_vm0, %v2196_v6 }
 0x47d   : > { %v933_v22 = vpop.f32.mrb[4].mxu0 }
 0x47e   : > { %v1917_v37 = vpop.f32.mrb[5].mxu0  ;;  %v939_v38 = vsel %vm587_vm1, %v933_v22, 0.0 }
 0x47f   : > { %940 = vadd.xlane.f32.xlu0 %v939_v38  ;;  %v1252_v37 = vld [vmem:[%s2684_s9 + $0x18] sm:$0xff] }
 0x482   : > { %v1107_v39 = vpop.f32.mrb[6].mxu0 }
 0x483   : > { %v1922_v40 = vpop.f32.mrb[7].mxu0  ;;  %v1113_v42 = vsel %vm587_vm1, %v1107_v39, 0.0 }
 0x484   : > { %1114 = vadd.xlane.f32.xlu1 %v1113_v42  ;;  %v2200_v42 = vmov -1.0  }
 0x50c   : > { %v941_v43 = vpop.xlane.xlu0 %940 }
 0x50d   : > { %v943_v44 = vmul.f32 0.03125, %v941_v43 }
 0x50f   : > { %v2497_v47 = vsub.f32 %v933_v22, %v943_v44  ;;  %v2005_v22 = vpack.c.bf16 %v1250_v34, %v1249_v33  ;;  %v1401_v33 = vstv %s1819_s5  ;;  %v1405_v34 = vstv %s1820_s22 }
 0x511   : > { %v1115_v45 = vpop.xlane.xlu1 %1114  ;;  %v945_v52 = vmul.f32 %v2497_v47, %v2497_v47  ;;  %2006 = vmatpush3.bf16.msra.mxu0 %v2005_v22  ;;  %v1409_v22 = vstv %s1821_s18 }
 0x512   : > { %v1116_v46 = vmul.f32 0.03125, %v1115_v45  ;;  %2007 = vmatprep.subr.bf16.mxu0 %v2194_v3 }
 0x513   : > { %v946_v53 = vsel %vm587_vm1, %v945_v52, 0.0 }
 0x514   : > { %v1117_v48 = vsub.f32 %v1107_v39, %v1116_v46  ;;  %v2008_v39 = vpack.c.bf16 %v1252_v37, %v1251_v35  ;;  %v1402_v35 = vsel %vm577_vm3, %v1401_v33, 0.0  ;;  %v1410_v37 = vsel %vm579_vm5, %v1409_v22, 0.0 }
 0x516   : > { %v1118_v50 = vmul.f32 %v1117_v48, %v1117_v48  ;;  %2009 = vmatpush3.bf16.msra.mxu0 %v2008_v39 }
 0x517   : > { %1953 = vmatprep.subr.mxu0 %v2196_v6 }
 0x518   : > { %v1119_v51 = vsel %vm587_vm1, %v1118_v50, 0.0 }
 0x519   : > { %1120 = vadd.xlane.f32.xlu0 %v1119_v51 }
 0x51d   : > { %947 = vadd.xlane.f32.xlu0 %v946_v53 }
 0x5a6   : > { %v1121_v2 = vpop.xlane.xlu0 %1120 }
 0x5a7   : > { %v1122_v4 = vmul.f32 0.03125, %v1121_v2 }
 0x5a9   : > { %v1123_v5 = vadd.f32 1e-05, %v1122_v4 }
 0x5aa   : > { %v948_v45 = vpop.xlane.xlu0 %947 }
 0x5ab   : > { %2086 = vrsqrt.f32 %v1123_v5  ;;  %v949_v51 = vmul.f32 0.03125, %v948_v45 }
 0x5ad   : > { %v950_v52 = vadd.f32 1e-05, %v949_v51 }
 0x5b5   : > { %v2087_v7 = vpop.eup %2086 }
 0x5b6   : > { %v1125_v9 = vmul.f32 %v2087_v7, %v1117_v48 }
 0x5b8   : > { %v1130_v11 = vmul.f32 %v1813_v8, %v1125_v9 }
 0x5ba   : > { %v1135_v12 = vadd.f32 %v1814_v10, %v1130_v11 }
 0x5bc   : > { %v1137_v13 = vmul.f32 0.70710677, %v1135_v12  ;;  %v1136_v46 = vmul.f32 0.5, %v1135_v12 }
 0x5be   : > { %v1140_v14 = vand.u32 2147483647, %v1137_v13  ;;  %vm1138_vm12 = vcmp.ge.f32.partialorder %v1137_v13, 0.0 }
 0x5bf   : > { %v1139_v43 = vsel %vm1138_vm12, 1.0, %v2200_v42 }
 0x5c0   : > { %v1141_v15 = vmul.f32 0.3275911, %v1140_v14  ;;  %v1154_v18 = vsub.f32 0.0, %v1140_v14 }
 0x5c2   : > { %v1142_v17 = vadd.f32 1.0, %v1141_v15  ;;  %v1155_v20 = vmul.f32 %v1154_v18, %v1140_v14 }
 0x5c4   : > { %2088 = vrcp.f32 %v1142_v17  ;;  %v1156_v24 = vmul.f32 1.442695, %v1155_v20 }
 0x5c6   : > { %2090 = vpow2.f32 %v1156_v24 }
 0x5c7   : > { %2092 = vrsqrt.f32 %v950_v52 }
 0x5ce   : > { %v2089_v19 = vpop.eup %2088 }
 0x5cf   : > { %v1145_v21 = vmul.f32 1.0614054, %v2089_v19 }
 0x5d0   : > { %v2091_v36 = vpop.eup %2090 }
 0x5d1   : > { %v1146_v23 = vadd.f32 -1.4531521, %v1145_v21  ;;  %v2093_v53 = vpop.eup %2092 }
 0x5d2   : > { %v952_v54 = vmul.f32 %v2093_v53, %v2497_v47 }
 0x5d3   : > { %v1147_v25 = vmul.f32 %v2089_v19, %v1146_v23 }
 0x5d4   : > { %v957_v56 = vmul.f32 %v1805_v55, %v952_v54 }
 0x5d5   : > { %v1148_v26 = vadd.f32 1.4214138, %v1147_v25 }
 0x5d6   : > { %v962_v58 = vadd.f32 %v1806_v57, %v957_v56 }
 0x5d7   : > { %v1149_v27 = vmul.f32 %v2089_v19, %v1148_v26 }
 0x5d8   : > { %v964_v59 = vmul.f32 0.70710677, %v962_v58  ;;  %v963_v20 = vmul.f32 0.5, %v962_v58 }
 0x5d9   : > { %v1150_v28 = vadd.f32 -0.28449672, %v1149_v27  ;;  %v1326_v27 = vld [vmem:[%s2685_s10] sm:$0x1] }
 0x5da   : > { %v967_v60 = vand.u32 2147483647, %v964_v59  ;;  %vm965_vm13 = vcmp.ge.f32.partialorder %v964_v59, 0.0 }
 0x5db   : > { %v1151_v29 = vmul.f32 %v2089_v19, %v1150_v28  ;;  %v966_v17 = vsel %vm965_vm13, 1.0, %v2200_v42 }
 0x5dc   : > { %v968_v61 = vmul.f32 0.3275911, %v967_v60  ;;  %v981_v4 = vsub.f32 0.0, %v967_v60 }
 0x5dd   : > { %v1152_v31 = vadd.f32 0.2548296, %v1151_v29 }
 0x5de   : > { %v969_v62 = vadd.f32 1.0, %v968_v61  ;;  %v982_v7 = vmul.f32 %v981_v4, %v967_v60 }
 0x5df   : > { %v1153_v32 = vmul.f32 %v2089_v19, %v1152_v31 }
 0x5e0   : > { %2094 = vrcp.f32 %v969_v62  ;;  %v983_v9 = vmul.f32 1.442695, %v982_v7  ;;  %v1575_v7 = vld [vmem:[%s2688_s13] sm:$0xff] }
 0x5e1   : > { %v1158_v38 = vmul.f32 %v2091_v36, %v1153_v32  ;;  %v1406_v36 = vsel %vm578_vm4, %v1405_v34, 0.0 }
 0x5e2   : > { %2096 = vpow2.f32 %v983_v9  ;;  %v1577_v9 = vld [vmem:[%s2688_s13 + $0x10] sm:$0xff] }
 0x5e3   : > { %v1159_v40 = vsub.f32 1.0, %v1158_v38  ;;  %v1413_v38 = vstv %s1822_s3 }
 0x5e5   : > { %v1160_v44 = vmul.f32 %v1159_v40, %v1139_v43  ;;  %v1414_v40 = vsel %vm580_vm6, %v1413_v38, 0.0  ;;  %v1417_v43 = vstv %s1823_s4  ;;  %s2632_s4 = scalar_lea.hbm %s2692_s17, %s1832_s26 }
 0x5e6   : > { %v1418_v45 = vsel %vm581_vm7, %v1417_v43, 0.0 }
 0x5e7   : > { %v1161_v48 = vadd.f32 1.0, %v1160_v44 }
 0x5e9   : > { %v1162_v50 = vmul.f32 %v1161_v48, %v1136_v46 }
 0x5ea   : > { %v2095_v63 = vpop.eup %2094 }
 0x5eb   : > { %1164 = vrot.lane.b32.xlu0 %v1162_v50, %s2201_s21  ;;  %v972_v0 = vmul.f32 1.0614054, %v2095_v63  ;;  %s564_s21 = sand.u32 1, %s2183_s25  }
 0x5ec   : > { %v2097_v13 = vpop.eup %2096  ;;  %s1793_s23 = sshll.u32 %s564_s21, 3  ;;  %s1691_s0 = scalar_lea.sflag [#allocation3], %s564_s21 }
 0x5ed   : > { %v973_v1 = vadd.f32 -1.4531521, %v972_v0  ;;  %s566_s5 = scalar_lea.vmem [#allocation5], %s1793_s23  ;;  %s2129_s23 = sshll.u32 %s2202_s28, 4  ;;  %s2130_s23 = int_to_ptr.vmem [resolvable:$false] %s2129_s23 }
 0x5ee   : > { %s1704_s22 = sshll.u32 %s566_s5, 4  ;;  %s2131_s29 = scalar_lea.vmem %s2130_s23, 256  ;;  %s2634_s22 = int_to_ptr.vmem [resolvable:$true] %s1704_s22 }
 0x5ef   : > { %v974_v2 = vmul.f32 %v2095_v63, %v973_v1  ;;  %s2125_s30 = scalar_lea.vmem %s2634_s22, 128  ;;  %p2132_p13 = scmp.lt.s32.totalorder %s2634_s22, %s2130_s23 }
 0x5f0   : > { %p2126_p10 = scmp.ne.s32.totalorder %s2634_s22, %s2125_s30  ;;  %p2133_p0 = scmp.lt.s32.totalorder %s2131_s29, %s2125_s30 }
 0x5f1   : > { %v975_v47 = vadd.f32 1.4214138, %v974_v2 }
 0x5f2   : > { %p2127_p11 = pnand %p2126_p10, %p2331_p5  ;;  %p2134_p1 = por %p2133_p0, %p2132_p13 }
 0x5f3   : > { %v976_v5 = vmul.f32 %v2095_v63, %v975_v47 }
 0x5f4   : > { %p2128_p12 = pneg %p2127_p11 }
 0x5f5   : > { %v977_v8 = vadd.f32 -0.28449672, %v976_v5 }
 0x5f6   : > { %p2135_p2 = pnand %p2134_p1, %p2128_p12 }
 0x5f7   : > { %v978_v10 = vmul.f32 %v2095_v63, %v977_v8  ;;  %v1576_v8 = vld [vmem:[%s2688_s13 + $0x8] sm:$0xff] }
 0x5f9   : > { %v979_v11 = vadd.f32 0.2548296, %v978_v10  ;;  %v2011_v10 = vpack.c.bf16 %v1576_v8, %v1575_v7 }
 0x5fb   : > { %v980_v12 = vmul.f32 %v2095_v63, %v979_v11  ;;  %v1578_v11 = vld [vmem:[%s2688_s13 + $0x18] sm:$0xff] }
 0x5fd   : > { %v985_v14 = vmul.f32 %v2097_v13, %v980_v12  ;;  %v2014_v12 = vpack.c.bf16 %v1578_v11, %v1577_v9 }
 0x5ff   : > { %v986_v15 = vsub.f32 1.0, %v985_v14 }
 0x601   : > { %v987_v18 = vmul.f32 %v986_v15, %v966_v17 }
 0x603   : > { %v988_v19 = vadd.f32 1.0, %v987_v18  ;;  %v1825_v18 = vld [vmem:[%s2686_s11] ss:$0 sm:$0xff] }
 0x605   : > { %v989_v21 = vmul.f32 %v988_v19, %v963_v20  ;;  %v1826_v20 = vld [vmem:[%s2687_s12] ss:$0 sm:$0xff] }
 0x65d   : > { %v1165_v23 = vpop.permute.xlu0 %1164 }
 0x65e   : > { %v1167_v24 = vsel %vm587_vm1, %v989_v21, %v1165_v23 }
 0x65f   : > { %1940 = vmatmul.mubr.msk.f32.vlgmr.msra.gmra.mrb[2].mxu1 %vm669_vm2, %v1167_v24 }
 0x660   : > { %1971 = vmatprep.mubr.msk.f32.mxu1 %vm2195_vm0, %v2196_v6  ;;  %2012 = vmatpush3.bf16.msra.mxu1 %v2011_v10 }
 0x661   : > { %2013 = vmatprep.subr.bf16.mxu1 %v2194_v3 }
 0x664   : > { %2015 = vmatpush3.bf16.msra.mxu1 %v2014_v12 }
 0x732   : > { %v1245_v25 = vpop.f32.mrb[2].mxu1 }
 0x733   : > { %v1941_v26 = vpop.f32.mrb[3].mxu1  ;;  %1951 = vmatmul.mubr.msk.f32.vlgmr.msra.gmra.mrb[8].mxu0 %vm587_vm1, %v1245_v25 }
 0x734   : > { %1954 = vmatpush3.xpose.msk.msra.mxu0 %vm587_vm1, %v1245_v25  ;;  %1955 = vmatprep.mubr.msk.f32.mxu0 %vm2195_vm0, %v2196_v6 }
 0x735   : > { %1958 = vmatprep.subr.mxu0 %v2196_v6 }
 0x737   : > { %1956 = vmatmul.mubr.msk.f32.vlgmr.msra.gmra.mrb[10].mxu0 %vm587_vm1, %v1326_v27 }
 0x738   : > { %1959 = vmatpush3.msra.mxu0 %v1245_v25  ;;  %1960 = vmatprep.mubr.msk.f32.mxu0 %vm2195_vm0, %v2196_v6  ;;  %v1407_v6 = vadd.f32 %v1406_v36, %v1402_v35 }
 0x73a   : > { %v1411_v39 = vadd.f32 %v1410_v37, %v1407_v6 }
 0x73c   : > { %v1415_v44 = vadd.f32 %v1414_v40, %v1411_v39 }
 0x73e   : > { %v1419_v48 = vadd.f32 %v1418_v45, %v1415_v44 }
 0x806   : > { %v1322_v28 = vpop.f32.mrb[8].mxu0 }
 0x807   : > { %1422 = vperm.xlu1 %2076, %v1322_v28   ;;  %v1952_v29 = vpop.f32.mrb[9].mxu0 }
 0x80a   : > { %v1396_v31 = vpop.f32.mrb[10].mxu0 }
 0x80b   : > { %v1957_v32 = vpop.f32.mrb[11].mxu0  ;;  %v1428_v46 = vrot.slane %v1396_v31, %v844_v49 }
 0x886   : > { %v1423_v50 = vpop.permute.xlu1 %1422 }
 0x887   : > { %v1429_v51 = vadd.f32 %v1428_v46, %v1423_v50 }
 0x889   : > { %v1430_v52 = vadd.f32 %v1429_v51, %v1419_v48  ;;  %v1827_v51 = vld [vmem:[%s2689_s14] ss:$0 sm:$0xff] }
 0x88b   : > { %vm1431_vm14 = vcmp.gt.f32.partialorder %v1430_v52, 0.0  ;;  %v1432_v53 = vmul.f32 0.2, %v1430_v52 }
 0x88d   : > { %v1433_v54 = vsel %vm1431_vm14, %v1430_v52, %v1432_v53 }
 0x88e   : > { %v1434_v55 = vsel %vm582_vm8, %v1433_v54, -9e+15 }
 0x88f   : > { %v1435_v56 = vsel %vm852_vm10, %v1434_v55, -inf }
 0x890   : > { %1436 = vmax.xlane.f32.xlu0 %v1435_v56 }
 0x91d   : > { %v1437_v57 = vpop.xlane.xlu0 %1436 }
 0x91e   : > { %v1438_v58 = vsub.f32 %v1434_v55, %v1437_v57 }
 0x920   : > { %v1439_v59 = vmul.f32 1.442695, %v1438_v58 }
 0x922   : > { %2098 = vpow2.f32 %v1439_v59 }
 0x92c   : > { %v2099_v60 = vpop.eup %2098 }
 0x92d   : > { %v1441_v41 = vsel %vm852_vm10, %v2099_v60, 0.0 }
 0x92e   : > { %1442 = vadd.xlane.f32.xlu1 %v1441_v41 }
 0x9bb   : > { %v1443_v49 = vpop.xlane.xlu1 %1442 }
 0x9bc   : > { %2100 = vrcp.f32 %v1443_v49 }
 0x9c6   : > { %v2101_v61 = vpop.eup %2100 }
 0x9c7   : > { %v1445_v62 = vmul.f32 %v2101_v61, %v2099_v60 }
 0x9c9   : > { %1961 = vmatmul.mubr.msk.f32.vlgmr.msra.gmra.mrb[12].mxu0 %vm852_vm10, %v1445_v62 }
 0xa9c   : > { %v1515_v63 = vpop.f32.mrb[12].mxu0 }
 0xa9d   : > { %v1962_v30 = vpop.f32.mrb[13].mxu0  ;;  %v1521_v0 = vsel %vm587_vm1, %v1515_v63, 0.0 }
 0xa9e   : > { %1522 = vadd.xlane.f32.xlu0 %v1521_v0  ;;  %v1830_v30 = vld [vmem:[%s2691_s16] ss:$0 sm:$0xff] }
 0xb2b   : > { %v1523_v1 = vpop.xlane.xlu0 %1522 }
 0xb2c   : > { %v1524_v2 = vmul.f32 0.03125, %v1523_v1 }
 0xb2e   : > { %v1525_v47 = vsub.f32 %v1515_v63, %v1524_v2 }
 0xb30   : > { %v1526_v4 = vmul.f32 %v1525_v47, %v1525_v47 }
 0xb32   : > { %v1527_v5 = vsel %vm587_vm1, %v1526_v4, 0.0 }
 0xb33   : > { %1528 = vadd.xlane.f32.xlu0 %v1527_v5 }
 0xbc0   : > { %v1529_v13 = vpop.xlane.xlu0 %1528 }
 0xbc1   : > { %v1530_v14 = vmul.f32 0.03125, %v1529_v13 }
 0xbc3   : > { %v1531_v15 = vadd.f32 1e-05, %v1530_v14 }
 0xbc5   : > { %2102 = vrsqrt.f32 %v1531_v15 }
 0xbcf   : > { %v2103_v17 = vpop.eup %2102 }
 0xbd0   : > { %v1533_v19 = vmul.f32 %v2103_v17, %v1525_v47 }
 0xbd2   : > { %v1540_v21 = vmul.f32 %v1825_v18, %v1533_v19 }
 0xbd4   : > { %v1547_v23 = vadd.f32 %v1826_v20, %v1540_v21 }
 0xbd6   : > { %v1549_v24 = vmul.f32 0.70710677, %v1547_v23  ;;  %v1548_v46 = vmul.f32 0.5, %v1547_v23 }
 0xbd8   : > { %v1552_v25 = vand.u32 2147483647, %v1549_v24  ;;  %vm1550_vm15 = vcmp.ge.f32.partialorder %v1549_v24, 0.0 }
 0xbd9   : > { %v1551_v44 = vsel %vm1550_vm15, 1.0, %v2200_v42 }
 0xbda   : > { %v1553_v3 = vmul.f32 0.3275911, %v1552_v25  ;;  %v1566_v27 = vsub.f32 0.0, %v1552_v25 }
 0xbdc   : > { %v1554_v26 = vadd.f32 1.0, %v1553_v3  ;;  %v1567_v29 = vmul.f32 %v1566_v27, %v1552_v25 }
 0xbde   : > { %2104 = vrcp.f32 %v1554_v26  ;;  %v1568_v33 = vmul.f32 1.442695, %v1567_v29 }
 0xbe0   : > { %2106 = vpow2.f32 %v1568_v33 }
 0xbe8   : > { %v2105_v28 = vpop.eup %2104 }
 0xbe9   : > { %v1557_v31 = vmul.f32 1.0614054, %v2105_v28 }
 0xbea   : > { %v2107_v39 = vpop.eup %2106 }
 0xbeb   : > { %v1558_v32 = vadd.f32 -1.4531521, %v1557_v31 }
 0xbed   : > { %v1559_v34 = vmul.f32 %v2105_v28, %v1558_v32 }
 0xbef   : > { %v1560_v35 = vadd.f32 1.4214138, %v1559_v34 }
 0xbf1   : > { %v1561_v36 = vmul.f32 %v2105_v28, %v1560_v35 }
 0xbf3   : > { %v1562_v22 = vadd.f32 -0.28449672, %v1561_v36 }
 0xbf5   : > { %v1563_v6 = vmul.f32 %v2105_v28, %v1562_v22 }
 0xbf7   : > { %v1564_v37 = vadd.f32 0.2548296, %v1563_v6 }
 0xbf9   : > { %v1565_v38 = vmul.f32 %v2105_v28, %v1564_v37 }
 0xbfb   : > { %v1570_v40 = vmul.f32 %v2107_v39, %v1565_v38 }
 0xbfd   : > { %v1571_v43 = vsub.f32 1.0, %v1570_v40 }
 0xbff   : > { %v1572_v45 = vmul.f32 %v1571_v43, %v1551_v44 }
 0xc01   : > { %v1573_v48 = vadd.f32 1.0, %v1572_v45 }
 0xc03   : > { %v1574_v50 = vmul.f32 %v1573_v48, %v1548_v46 }
 0xc05   : > { %1972 = vmatmul.mubr.msk.f32.vlgmr.msra.gmra.mrb[4].mxu1 %vm587_vm1, %v1574_v50 }
 0xcd8   : > { %v1655_v52 = vpop.f32.mrb[4].mxu1 }
 0xcd9   : > { %v1656_v53 = vadd.f32 %v1827_v51, %v1655_v52  ;;  %v1973_v54 = vpop.f32.mrb[5].mxu1 }
 0xcdb   : > { %v1659_v55 = vadd.f32 %v1656_v53, %v2407_v16  ;;  %v1829_v16 = vld [vmem:[%s2690_s15] ss:$0 sm:$0xff] }
 0xcdd   : > { %v1662_v56 = vsel %vm587_vm1, %v1659_v55, 0.0 }
 0xcde   : > { %1663 = vadd.xlane.f32.xlu0 %v1662_v56 }
 0xd6b   : > { %v1664_v42 = vpop.xlane.xlu0 %1663 }
 0xd6c   : > { %v1665_v57 = vmul.f32 0.03125, %v1664_v42 }
 0xd6e   : > { %v1666_v58 = vsub.f32 %v1659_v55, %v1665_v57 }
 0xd70   : > { %v1667_v59 = vmul.f32 %v1666_v58, %v1666_v58 }
 0xd72   : > { %v1668_v60 = vsel %vm587_vm1, %v1667_v59, 0.0 }
 0xd73   : > { %1669 = vadd.xlane.f32.xlu1 %v1668_v60 }
 0xe00   : > { %v1670_v41 = vpop.xlane.xlu1 %1669 }
 0xe01   : > { %v1671_v49 = vmul.f32 0.03125, %v1670_v41 }
 0xe03   : > { %v1672_v61 = vadd.f32 1e-05, %v1671_v49 }
 0xe05   : > { %2108 = vrsqrt.f32 %v1672_v61 }
 0xe0f   : > { %v2109_v62 = vpop.eup %2108 }
 0xe10   : > { %v1674_v63 = vmul.f32 %v2109_v62, %v1666_v58 }
 0xe12   : > { %v1681_v0 = vmul.f32 %v1829_v16, %v1674_v63 }
 0xe14   : > { %v1688_v1 = vadd.f32 %v1830_v30, %v1681_v0 }
 0xe16   : > { %1689 = vst.msk [vmem:[%s566_s5] sm:$0xff] %vm587_vm1, %v1688_v1 }
 0xe17   : > { %2138 = shalt.err (!%p2135_p2)
}
 0xe18   : > { %s2139_s21 = scalar_lea.hbm %s2632_s4, 128  ;;  %s2143_s26 = scalar_lea.hbm %s2692_s17, 256 }
 0xe19   : > { %p2140_p3 = scmp.ne.s32.totalorder %s2632_s4, %s2139_s21  ;;  %p2144_p8 = scmp.lt.u32.totalorder %s2632_s4, %s2692_s17 }
 0xe1a   : > { %p2145_p9 = scmp.lt.u32.totalorder %s2143_s26, %s2139_s21  ;;  %p2147_p11 = scmp.lt.u32.totalorder %s2139_s21, %s2632_s4 }
 0xe1b   : > { %p2141_p4 = pnand %p2140_p3, %p2331_p5 }
 0xe1c   : > { %p2146_p10 = por %p2145_p9, %p2144_p8 }
 0xe1d   : > { %p2142_p7 = pneg %p2141_p4 }
 0xe1e   : > { %p2148_p12 = por %p2147_p11, %p2146_p10 }
 0xe20   : > { %p2149_p13 = pnand %p2148_p12, %p2142_p7 }
 0xe22   : > { %2152 = shalt.err (!%p2149_p13)
}
 0xe23   : > { %2020 = dma.vmem_to_hbm [thread:$0]  (%p2331_p5), %s2634_s22, 128, %s2632_s4, %s1691_s0  }
 0xe24 PF: > { %p2032_p0 = scmp.ge.s32.totalorder %s2191_s27, 2  ;;  %s1716_s3 = sand.u32 1, %s2179_s24  }
 0xe25   : > { %s1717_s30 = scalar_lea.sflag [#allocation3], %s1716_s3 }
 0xe26   : > { %p2027_p1 = pnand %p2032_p0, %p2335_p6 }
 0xe28   : > { %2174 = dma.done.wait (!%p2027_p1), %s1717_s30, 128  }
 0xe29   : > { %2176 = vsyncadd (!%p2027_p1), %s1717_s30, 4294967168  ;;  %s2714_s27 = sld [smem:[#allocation9_spill]]  ;;  %s2715_s28 = sld [smem:[#allocation8_spill]] }
 0xe2a   : > { %s2716_s26 = sld [smem:[#allocation10_spill]]  ;;  %s2717_s24 = smov %s2183_s25 }
 0xe2f   : > { %p28_p2 = scmp.ge.s32.totalorder %s2714_s27, 4   ;;  %s2718_s25 = smov %s2715_s28 }
 0xe31   :  { %30 = sbr.rel (!%p28_p2) target bundleno = 11 (0xb), region = 131 }
 0xe38   :  { %1722 = vsyncpa [#allocation3], 1 }
 0xe39   :  { %1724 = vsyncpa [#allocation3 + $0x1], 1 }
 0xe3a   :  { %1725 = vsyncpa [#allocation4], 1 }
 0xe3b   :  { %1727 = vsyncpa [#allocation4 + $0x1], 1 }

</bundles_post_ra>
